<compile_context>
chip_gen: v6e
topology: v6e:2x2x1
jax: 0.10.0
libtpu: 0.0.40
codegen_flags: <defaults>
</compile_context>

<pallas_src>
import math
import functools

import jax
import jax.numpy as jnp
from jax import lax
from jax.experimental import pallas as pl
from jax.experimental.pallas import tpu as pltpu


# ----------------------------------------------------------------------------
# small shared helpers (used both inside kernels and in the pure-JAX reference)
# ----------------------------------------------------------------------------

def _layer_norm(x, gamma, beta, eps=1e-5):
    mu = jnp.mean(x, axis=-1, keepdims=True)
    xc = x - mu
    var = jnp.mean(xc * xc, axis=-1, keepdims=True)
    return xc * lax.rsqrt(var + eps) * gamma + beta


def _gelu(x):
    # TODO(synk): PyTorch nn.GELU() default is the exact erf form; the tanh
    # approximation is used here for guaranteed Mosaic lowering (diff < 1e-3).
    c = math.sqrt(2.0 / math.pi)
    return 0.5 * x * (1.0 + jnp.tanh(c * (x + 0.044715 * x * x * x)))


def _round_up(x, m):
    return (x + m - 1) // m * m


def _row_tile(m, max_tile):
    """Pad row count to a multiple of 8 and pick a row tile (<= max_tile)."""
    mp = _round_up(max(m, 8), 8)
    tm = min(max_tile, mp)
    mp = _round_up(mp, tm)
    return mp, tm


# ----------------------------------------------------------------------------
# Kernel A: fused per-entity pipeline
#   QuantumStateEncoder -> composite QuantumOperator -> state_decoder
#   + relation_inference first-layer halves (A = real@W1a + b1, B = real@W1b)
# ----------------------------------------------------------------------------

def _entity_kernel(x_ref, wcat_ref, bcat_ref, wp2_ref, bp2_ref, opc_ref,
                   wra_ref, wrb_ref, br1_ref,
                   wd1_ref, bd1_ref, gd1_ref, bed1_ref,
                   wd2_ref, bd2_ref, gd2_ref, bed2_ref,
                   state_ref, phase_ref, rela_ref, relb_ref, dec_ref,
                   *, state_dim):
    S = state_dim
    x = x_ref[...]                                               # (tm, E)

    # fused real|imag|phase1 projection: one (E, 3S) matmul + Tanh
    h3 = jnp.tanh(
        jnp.dot(x, wcat_ref[...], preferred_element_type=jnp.float32) + bcat_ref[...])
    real_amp = h3[:, 0:S]
    imag_amp = h3[:, S:2 * S]
    h = h3[:, 2 * S:3 * S]

    # phase encoding second layer, scaled by pi
    phases = jnp.tanh(
        jnp.dot(h, wp2_ref[...], preferred_element_type=jnp.float32) + bp2_ref[...])
    phases = phases * math.pi
    cosp = jnp.cos(phases)
    sinp = jnp.sin(phases)

    # complex rotation by the encoded phase
    rw = real_amp * cosp - imag_amp * sinp
    iw = real_amp * sinp + imag_amp * cosp

    # normalize to unit norm over the state dimension
    sq = jnp.sum(rw * rw + iw * iw, axis=-1, keepdims=True)
    inv = lax.rsqrt(sq + 1e-12)

    # lane-dense packed state [real | imag]  -> (tm, 2S) = (tm, 128)
    state = jnp.concatenate([rw * inv, iw * inv], axis=-1)

    # composite quantum operator (all inference steps folded into one block matmul):
    #   [r, i] @ [[Or, Oi], [-Oi, Or]] = [r@Or - i@Oi, r@Oi + i@Or]
    state = jnp.dot(state, opc_ref[...], preferred_element_type=jnp.float32)

    state_ref[...] = state
    phase_ref[...] = phases

    real = state[:, 0:S]                                         # (tm, S)

    # relation_inference first layer, split into the per-entity halves
    rela_ref[...] = jnp.dot(real, wra_ref[...],
                            preferred_element_type=jnp.float32) + br1_ref[...]
    relb_ref[...] = jnp.dot(real, wrb_ref[...],
                            preferred_element_type=jnp.float32)

    # state_decoder: Linear + LN + GELU + Linear + LN   (Dropout = identity in eval)
    hd = jnp.dot(real, wd1_ref[...], preferred_element_type=jnp.float32) + bd1_ref[...]
    hd = _gelu(_layer_norm(hd, gd1_ref[...], bed1_ref[...]))
    y = jnp.dot(hd, wd2_ref[...], preferred_element_type=jnp.float32) + bd2_ref[...]
    dec_ref[...] = _layer_norm(y, gd2_ref[...], bed2_ref[...])


def entity_pipeline(entity_emb, params, *, max_tile=512):
    """entity_emb: [N, E] -> dict with post-operator 'real'/'imag', 'phases',
    relation first-layer halves 'rel_a'/'rel_b' ([N, H]) and decoded 'enhanced' ([N, E])."""
    x = jnp.asarray(entity_emb, jnp.float32)
    N, E = x.shape
    S = params["w_phase2"].shape[0]
    H = params["rel_w1"].shape[1]

    # fuse the three E->S projections into one (E, 3S) weight / (1, 3S) bias
    w_cat = jnp.concatenate(
        [params["w_real"], params["w_imag"], params["w_phase1"]], axis=1)
    b_cat = jnp.concatenate(
        [params["b_real"], params["b_imag"], params["b_phase1"]], axis=1)

    # pre-compose the inference operators (left-to-right, matching step order)
    ops = params["op_blocks"]
    op_comp = ops[0]
    for s in range(1, ops.shape[0]):
        op_comp = jnp.dot(op_comp, ops[s], preferred_element_type=jnp.float32)

    # split the relation first-layer weight:  cat([ri, rj]) @ W1 = ri@W1a + rj@W1b
    w_rel_a = params["rel_w1"][:S, :]
    w_rel_b = params["rel_w1"][S:, :]

    Mp, tm = _row_tile(N, max_tile)
    xp = jnp.zeros((Mp, E), jnp.float32).at[:N].set(x)

    flops = Mp * (2 * E * 3 * S + 2 * S * S + 2 * (2 * S) * (2 * S)
                  + 3 * 2 * S * H + 2 * H * E + 20 * S + 15 * H + 15 * E)
    trans = Mp * (6 * S + H + 4)
    bytes_acc = 4 * (Mp * E + E * 3 * S + 5 * S * S + 3 * S * H + H * E
                     + Mp * (3 * S + 2 * H + E) + 8 * H + 8 * E + 4 * S)

    kern = functools.partial(_entity_kernel, state_dim=S)

    full = lambda i: (0, 0)
    rowb = lambda i: (i, 0)

    packed, phases, rel_a, rel_b, dec = pl.pallas_call(
        kern,
        out_shape=(jax.ShapeDtypeStruct((Mp, 2 * S), jnp.float32),
                   jax.ShapeDtypeStruct((Mp, S), jnp.float32),
                   jax.ShapeDtypeStruct((Mp, H), jnp.float32),
                   jax.ShapeDtypeStruct((Mp, H), jnp.float32),
                   jax.ShapeDtypeStruct((Mp, E), jnp.float32)),
        grid_spec=pltpu.PrefetchScalarGridSpec(
            num_scalar_prefetch=0,
            grid=(Mp // tm,),
            in_specs=[pl.BlockSpec((tm, E), rowb),
                      pl.BlockSpec((E, 3 * S), full),
                      pl.BlockSpec((1, 3 * S), full),
                      pl.BlockSpec((S, S), full),
                      pl.BlockSpec((1, S), full),
                      pl.BlockSpec((2 * S, 2 * S), full),
                      pl.BlockSpec((S, H), full),
                      pl.BlockSpec((S, H), full),
                      pl.BlockSpec((1, H), full),
                      pl.BlockSpec((S, H), full),
                      pl.BlockSpec((1, H), full),
                      pl.BlockSpec((1, H), full),
                      pl.BlockSpec((1, H), full),
                      pl.BlockSpec((H, E), full),
                      pl.BlockSpec((1, E), full),
                      pl.BlockSpec((1, E), full),
                      pl.BlockSpec((1, E), full)],
            out_specs=[pl.BlockSpec((tm, 2 * S), rowb),
                       pl.BlockSpec((tm, S), rowb),
                       pl.BlockSpec((tm, H), rowb),
                       pl.BlockSpec((tm, H), rowb),
                       pl.BlockSpec((tm, E), rowb)]),
        compiler_params=pltpu.CompilerParams(dimension_semantics=("parallel",)),
        cost_estimate=pl.CostEstimate(flops=flops, transcendentals=trans,
                                      bytes_accessed=bytes_acc),
    )(xp, w_cat, b_cat, params["w_phase2"], params["b_phase2"], op_comp,
      w_rel_a, w_rel_b, params["rel_b1"],
      params["dec_w1"], params["dec_b1"], params["dec_ln1_g"], params["dec_ln1_b"],
      params["dec_w2"], params["dec_b2"], params["dec_ln2_g"], params["dec_ln2_b"])

    return {"real": packed[:N, :S],
            "imag": packed[:N, S:],
            "phases": phases[:N],
            "rel_a": rel_a[:N],
            "rel_b": rel_b[:N],
            "enhanced": dec[:N]}


# ----------------------------------------------------------------------------
# Kernel B: relation_inference over all ordered pairs, using precomputed halves
#   rel_states[i, j] = (GELU(LN(A_i + B_j)) @ W2 + b2)
# ----------------------------------------------------------------------------

def _relation_kernel(a_ref, ball_ref, g_ref, be_ref, w2_ref, b2_ref, out_ref,
                     *, row_tile):
    b_all = ball_ref[...]                                        # (tj, H)
    g = g_ref[...]
    be = be_ref[...]
    w2 = w2_ref[...]
    b2 = b2_ref[...]
    # static unrolled loop over the small row tile; all in-kernel tensors stay 2-D
    for ii in range(row_tile):
        h = a_ref[pl.ds(ii, 1), :] + b_all                       # (tj, H)
        h = _gelu(_layer_norm(h, g, be))                         # Dropout = identity (eval)
        out_ref[ii] = jnp.dot(h, w2, preferred_element_type=jnp.float32) + b2


def relation_inference(rel_a, rel_b, params, *, row_tile=8, col_tile=256):
    """rel_a/rel_b: [N, H] first-layer halves -> relation states for all ordered
    pairs, [N, N, Q]."""
    A = jnp.asarray(rel_a, jnp.float32)
    B = jnp.asarray(rel_b, jnp.float32)
    N, H = A.shape
    Q = params["rel_w2"].shape[1]

    Pr, ti = _row_tile(N, row_tile)
    Pc, tj = _row_tile(N, col_tile)
    Ap = jnp.zeros((Pr, H), jnp.float32).at[:N].set(A)
    Bp = jnp.zeros((Pc, H), jnp.float32).at[:N].set(B)

    flops = Pr * Pc * (2 * H * Q + 14 * H + 2 * Q)
    trans = Pr * Pc * (H + 1)
    bytes_acc = 4 * (Pr * H + Pc * H + H * Q + Pr * Pc * Q + 4 * H + 2 * Q)

    kern = functools.partial(_relation_kernel, row_tile=ti)
    full = lambda i, j: (0, 0)

    out = pl.pallas_call(
        kern,
        out_shape=jax.ShapeDtypeStruct((Pr, Pc, Q), jnp.float32),
        grid_spec=pltpu.PrefetchScalarGridSpec(
            num_scalar_prefetch=0,
            grid=(Pr // ti, Pc // tj),
            in_specs=[pl.BlockSpec((ti, H), lambda i, j: (i, 0)),
                      pl.BlockSpec((tj, H), lambda i, j: (j, 0)),
                      pl.BlockSpec((1, H), full),
                      pl.BlockSpec((1, H), full),
                      pl.BlockSpec((H, Q), full),
                      pl.BlockSpec((1, Q), full)],
            out_specs=pl.BlockSpec((ti, tj, Q), lambda i, j: (i, j, 0))),
        compiler_params=pltpu.CompilerParams(
            dimension_semantics=("parallel", "parallel")),
        cost_estimate=pl.CostEstimate(flops=flops, transcendentals=trans,
                                      bytes_accessed=bytes_acc),
    )(Ap, Bp, params["rel_ln_g"], params["rel_ln_b"],
      params["rel_w2"], params["rel_b2"])

    return out[:N, :N]


# ----------------------------------------------------------------------------
# Full QuantumInference forward (numeric parts)
# ----------------------------------------------------------------------------

def quantum_inference_forward(entity_emb, params):
    ent = entity_pipeline(entity_emb, params)
    rel_states = relation_inference(ent["rel_a"], ent["rel_b"], params)
    enhanced = ent["enhanced"]

    N = entity_emb.shape[0]
    Q = ent["real"].shape[-1]
    confidence = jnp.minimum(1.0, jnp.linalg.norm(rel_states, axis=-1) / math.sqrt(Q))
    confidence = jnp.where(jnp.eye(N, dtype=bool), 0.0, confidence)   # skip i == j pairs
    relation_scores = jnp.sum(rel_states, axis=-1)
    # TODO(synk): relation-type enum mapping (int(sum*10) % len(RelationType)),
    # existing-relation set filtering and the >0.7 threshold loop are host-side
    # Python/dict logic over undefined Relation/RelationType classes; not kernel work.
    meta = {"relation_states": rel_states,
            "relation_scores": relation_scores,
            "confidence": confidence,
            "quantum_states": {"real": ent["real"], "imag": ent["imag"],
                               "phases": ent["phases"]}}
    return enhanced, meta


# ----------------------------------------------------------------------------
# Parameter init (mimics torch defaults) and pure-JAX reference
# ----------------------------------------------------------------------------

def init_params(key, embedding_dim, quantum_dim=64, hidden_dim=256,
                num_qubits=6, num_inference_steps=3):
    state_dim = 2 ** num_qubits
    assert state_dim == quantum_dim, "only the state_dim == quantum_dim path is implemented"
    ks = list(jax.random.split(key, 20))
    kit = iter(ks)

    def lin(fan_in, fan_out):
        bound = 1.0 / math.sqrt(fan_in)
        w = jax.random.uniform(next(kit), (fan_in, fan_out), jnp.float32, -bound, bound)
        b = jax.random.uniform(next(kit), (1, fan_out), jnp.float32, -bound, bound)
        return w, b

    w_real, b_real = lin(embedding_dim, state_dim)
    w_imag, b_imag = lin(embedding_dim, state_dim)
    w_phase1, b_phase1 = lin(embedding_dim, state_dim)
    w_phase2, b_phase2 = lin(state_dim, state_dim)
    rel_w1, rel_b1 = lin(2 * quantum_dim, hidden_dim)
    rel_w2, rel_b2 = lin(hidden_dim, quantum_dim)
    dec_w1, dec_b1 = lin(quantum_dim, hidden_dim)
    dec_w2, dec_b2 = lin(hidden_dim, embedding_dim)

    # custom QuantumOperators: orthogonal-initialized real / imaginary parts
    op_real = jax.random.orthogonal(next(kit), quantum_dim,
                                    shape=(num_inference_steps,)).astype(jnp.float32)
    op_imag = jax.random.orthogonal(next(kit), quantum_dim,
                                    shape=(num_inference_steps,)).astype(jnp.float32)
    top = jnp.concatenate([op_real, op_imag], axis=2)
    bot = jnp.concatenate([-op_imag, op_real], axis=2)
    op_blocks = jnp.concatenate([top, bot], axis=1)              # (steps, 2Q, 2Q)

    return {
        "w_real": w_real, "b_real": b_real,
        "w_imag": w_imag, "b_imag": b_imag,
        "w_phase1": w_phase1, "b_phase1": b_phase1,
        "w_phase2": w_phase2, "b_phase2": b_phase2,
        "op_real": op_real, "op_imag": op_imag, "op_blocks": op_blocks,
        "rel_w1": rel_w1, "rel_b1": rel_b1,
        "rel_ln_g": jnp.ones((1, hidden_dim), jnp.float32),
        "rel_ln_b": jnp.zeros((1, hidden_dim), jnp.float32),
        "rel_w2": rel_w2, "rel_b2": rel_b2,
        "dec_w1": dec_w1, "dec_b1": dec_b1,
        "dec_ln1_g": jnp.ones((1, hidden_dim), jnp.float32),
        "dec_ln1_b": jnp.zeros((1, hidden_dim), jnp.float32),
        "dec_w2": dec_w2, "dec_b2": dec_b2,
        "dec_ln2_g": jnp.ones((1, embedding_dim), jnp.float32),
        "dec_ln2_b": jnp.zeros((1, embedding_dim), jnp.float32),
        # QuantumStateEncoder.normalization exists in the module but is unused in forward()
        "normalization": jnp.ones((1,), jnp.float32),
    }


def _ref_encode_and_infer(x, params):
    x = x.astype(jnp.float32)
    real_amp = jnp.tanh(x @ params["w_real"] + params["b_real"])
    imag_amp = jnp.tanh(x @ params["w_imag"] + params["b_imag"])
    h = jnp.tanh(x @ params["w_phase1"] + params["b_phase1"])
    phases = jnp.tanh(h @ params["w_phase2"] + params["b_phase2"]) * math.pi
    cosp, sinp = jnp.cos(phases), jnp.sin(phases)
    rw = real_amp * cosp - imag_amp * sinp
    iw = real_amp * sinp + imag_amp * cosp
    norm = jnp.sqrt(jnp.sum(rw * rw + iw * iw, axis=-1, keepdims=True) + 1e-12)
    r, im = rw / norm, iw / norm
    for s in range(params["op_blocks"].shape[0]):                # step-by-step reference
        Or, Oi = params["op_real"][s], params["op_imag"][s]
        r, im = r @ Or - im @ Oi, r @ Oi + im @ Or
    return {"real": r, "imag": im, "phases": phases}


def _ref_relation(real_states, params):
    N, Q = real_states.shape
    pairs = jnp.concatenate([jnp.repeat(real_states, N, axis=0),
                             jnp.tile(real_states, (N, 1))], axis=-1)
    h = pairs @ params["rel_w1"] + params["rel_b1"]
    h = _gelu(_layer_norm(h, params["rel_ln_g"], params["rel_ln_b"]))
    return (h @ params["rel_w2"] + params["rel_b2"]).reshape(N, N, Q)


def _ref_decode(real_states, params):
    h = real_states @ params["dec_w1"] + params["dec_b1"]
    h = _gelu(_layer_norm(h, params["dec_ln1_g"], params["dec_ln1_b"]))
    y = h @ params["dec_w2"] + params["dec_b2"]
    return _layer_norm(y, params["dec_ln2_g"], params["dec_ln2_b"])


if __name__ == "__main__":
    # Small shapes consistent with the module defaults:
    # embedding_dim=32, quantum_dim=state_dim=64 (num_qubits=6), hidden_dim=256,
    # num_inference_steps=3, and a toy knowledge graph with 16 entities.
    E, Q, H, N = 32, 64, 256, 16

    key = jax.random.PRNGKey(0)
    k_x, k_p = jax.random.split(key)
    entity_emb = jax.random.normal(k_x, (N, E), dtype=jnp.float32)
    params = init_params(k_p, E, quantum_dim=Q, hidden_dim=H,
                         num_qubits=6, num_inference_steps=3)

    enhanced, meta = quantum_inference_forward(entity_emb, params)
    jax.block_until_ready((enhanced, meta))

    # Correctness checks against a pure-JAX reference (un-fused, per-step operators,
    # concatenated-pair relation MLP) to validate the fusion / composition tricks.
    ref_states = _ref_encode_and_infer(entity_emb, params)
    for name in ("real", "imag", "phases"):
        assert jnp.allclose(meta["quantum_states"][name], ref_states[name],
                            atol=1e-4, rtol=1e-4), name

    ref_rel = _ref_relation(ref_states["real"], params)
    assert jnp.allclose(meta["relation_states"], ref_rel, atol=1e-4, rtol=1e-4), "relations"

    ref_dec = _ref_decode(ref_states["real"], params)
    assert jnp.allclose(enhanced, ref_dec, atol=1e-4, rtol=1e-4), "decoder"

    print("KERNEL_OK")
</pallas_src>

<mosaic_0001>
module attributes {stable_mosaic.version = 11 : i64} {
  func.func @_entity_kernel(%arg0: i32, %arg1: memref<16x32xf32, #tpu.memory_space<vmem>>, %arg2: memref<32x192xf32, #tpu.memory_space<vmem>>, %arg3: memref<1x192xf32, #tpu.memory_space<vmem>>, %arg4: memref<64x64xf32, #tpu.memory_space<vmem>>, %arg5: memref<1x64xf32, #tpu.memory_space<vmem>>, %arg6: memref<128x128xf32, #tpu.memory_space<vmem>>, %arg7: memref<64x256xf32, #tpu.memory_space<vmem>>, %arg8: memref<64x256xf32, #tpu.memory_space<vmem>>, %arg9: memref<1x256xf32, #tpu.memory_space<vmem>>, %arg10: memref<64x256xf32, #tpu.memory_space<vmem>>, %arg11: memref<1x256xf32, #tpu.memory_space<vmem>>, %arg12: memref<1x256xf32, #tpu.memory_space<vmem>>, %arg13: memref<1x256xf32, #tpu.memory_space<vmem>>, %arg14: memref<256x32xf32, #tpu.memory_space<vmem>>, %arg15: memref<1x32xf32, #tpu.memory_space<vmem>>, %arg16: memref<1x32xf32, #tpu.memory_space<vmem>>, %arg17: memref<1x32xf32, #tpu.memory_space<vmem>>, %arg18: memref<16x128xf32, #tpu.memory_space<vmem>>, %arg19: memref<16x64xf32, #tpu.memory_space<vmem>>, %arg20: memref<16x256xf32, #tpu.memory_space<vmem>>, %arg21: memref<16x256xf32, #tpu.memory_space<vmem>>, %arg22: memref<16x32xf32, #tpu.memory_space<vmem>>) attributes {dimension_semantics = [#tpu.dimension_semantics<parallel>], iteration_bounds = array<i64: 1>, scalar_prefetch = 0 : i64, scratch_operands = 0 : i64, tpu.core_type = #tpu.core_type<tc>, window_params = [{transform_indices = @transform_0, window_bounds = array<i64: 16, 32>}, {pipeline_mode = #tpu.pipeline_mode<synchronous>, transform_indices = @transform_1, window_bounds = array<i64: 32, 192>}, {pipeline_mode = #tpu.pipeline_mode<synchronous>, transform_indices = @transform_2, window_bounds = array<i64: 1, 192>}, {pipeline_mode = #tpu.pipeline_mode<synchronous>, transform_indices = @transform_3, window_bounds = array<i64: 64, 64>}, {pipeline_mode = #tpu.pipeline_mode<synchronous>, transform_indices = @transform_4, window_bounds = array<i64: 1, 64>}, {pipeline_mode = #tpu.pipeline_mode<synchronous>, transform_indices = @transform_5, window_bounds = array<i64: 128, 128>}, {pipeline_mode = #tpu.pipeline_mode<synchronous>, transform_indices = @transform_6, window_bounds = array<i64: 64, 256>}, {pipeline_mode = #tpu.pipeline_mode<synchronous>, transform_indices = @transform_7, window_bounds = array<i64: 64, 256>}, {pipeline_mode = #tpu.pipeline_mode<synchronous>, transform_indices = @transform_8, window_bounds = array<i64: 1, 256>}, {pipeline_mode = #tpu.pipeline_mode<synchronous>, transform_indices = @transform_9, window_bounds = array<i64: 64, 256>}, {pipeline_mode = #tpu.pipeline_mode<synchronous>, transform_indices = @transform_10, window_bounds = array<i64: 1, 256>}, {pipeline_mode = #tpu.pipeline_mode<synchronous>, transform_indices = @transform_11, window_bounds = array<i64: 1, 256>}, {pipeline_mode = #tpu.pipeline_mode<synchronous>, transform_indices = @transform_12, window_bounds = array<i64: 1, 256>}, {pipeline_mode = #tpu.pipeline_mode<synchronous>, transform_indices = @transform_13, window_bounds = array<i64: 256, 32>}, {pipeline_mode = #tpu.pipeline_mode<synchronous>, transform_indices = @transform_14, window_bounds = array<i64: 1, 32>}, {pipeline_mode = #tpu.pipeline_mode<synchronous>, transform_indices = @transform_15, window_bounds = array<i64: 1, 32>}, {pipeline_mode = #tpu.pipeline_mode<synchronous>, transform_indices = @transform_16, window_bounds = array<i64: 1, 32>}, {transform_indices = @transform_17, window_bounds = array<i64: 16, 128>}, {transform_indices = @transform_18, window_bounds = array<i64: 16, 64>}, {transform_indices = @transform_19, window_bounds = array<i64: 16, 256>}, {transform_indices = @transform_20, window_bounds = array<i64: 16, 256>}, {transform_indices = @transform_21, window_bounds = array<i64: 16, 32>}]} {
    %c0 = arith.constant 0 : index
    %c0_0 = arith.constant 0 : index
    %0 = vector.load %arg1[%c0, %c0_0] : memref<16x32xf32, #tpu.memory_space<vmem>>, vector<16x32xf32>
    %c0_1 = arith.constant 0 : index
    %c0_2 = arith.constant 0 : index
    %1 = vector.load %arg2[%c0_1, %c0_2] : memref<32x192xf32, #tpu.memory_space<vmem>>, vector<32x192xf32>
    %cst = arith.constant dense<0.000000e+00> : vector<16x192xf32>
    %2 = tpu.matmul %0, %1, %cst {dimension_numbers = #tpu.dot_dimension_numbers<[1], [0], [0], [1], [0, 0, 1, 1], [], []>} : vector<16x32xf32>, vector<32x192xf32>, vector<16x192xf32> -> vector<16x192xf32>
    %c0_3 = arith.constant 0 : index
    %c0_4 = arith.constant 0 : index
    %3 = vector.load %arg3[%c0_3, %c0_4] : memref<1x192xf32, #tpu.memory_space<vmem>>, vector<1x192xf32>
    %4 = vector.broadcast %3 : vector<1x192xf32> to vector<16x192xf32>
    %5 = arith.addf %2, %4 : vector<16x192xf32>
    %6 = math.tanh %5 : vector<16x192xf32>
    %7 = vector.extract_strided_slice %6 {offsets = [0, 0], sizes = [16, 64], strides = [1, 1]} : vector<16x192xf32> to vector<16x64xf32>
    %8 = vector.extract_strided_slice %6 {offsets = [0, 64], sizes = [16, 64], strides = [1, 1]} : vector<16x192xf32> to vector<16x64xf32>
    %9 = vector.extract_strided_slice %6 {offsets = [0, 128], sizes = [16, 64], strides = [1, 1]} : vector<16x192xf32> to vector<16x64xf32>
    %c0_5 = arith.constant 0 : index
    %c0_6 = arith.constant 0 : index
    %10 = vector.load %arg4[%c0_5, %c0_6] : memref<64x64xf32, #tpu.memory_space<vmem>>, vector<64x64xf32>
    %cst_7 = arith.constant dense<0.000000e+00> : vector<16x64xf32>
    %11 = tpu.matmul %9, %10, %cst_7 {dimension_numbers = #tpu.dot_dimension_numbers<[1], [0], [0], [1], [0, 0, 1, 1], [], []>} : vector<16x64xf32>, vector<64x64xf32>, vector<16x64xf32> -> vector<16x64xf32>
    %c0_8 = arith.constant 0 : index
    %c0_9 = arith.constant 0 : index
    %12 = vector.load %arg5[%c0_8, %c0_9] : memref<1x64xf32, #tpu.memory_space<vmem>>, vector<1x64xf32>
    %13 = vector.broadcast %12 : vector<1x64xf32> to vector<16x64xf32>
    %14 = arith.addf %11, %13 : vector<16x64xf32>
    %15 = math.tanh %14 : vector<16x64xf32>
    %cst_10 = arith.constant 3.14159274 : f32
    %16 = vector.broadcast %cst_10 : f32 to vector<16x64xf32>
    %17 = arith.mulf %15, %16 : vector<16x64xf32>
    %18 = math.cos %17 : vector<16x64xf32>
    %19 = math.sin %17 : vector<16x64xf32>
    %20 = arith.mulf %7, %18 : vector<16x64xf32>
    %21 = arith.mulf %8, %19 : vector<16x64xf32>
    %22 = arith.subf %20, %21 : vector<16x64xf32>
    %23 = arith.mulf %7, %19 : vector<16x64xf32>
    %24 = arith.mulf %8, %18 : vector<16x64xf32>
    %25 = arith.addf %23, %24 : vector<16x64xf32>
    %26 = arith.mulf %22, %22 : vector<16x64xf32>
    %27 = arith.mulf %25, %25 : vector<16x64xf32>
    %28 = arith.addf %26, %27 : vector<16x64xf32>
    %cst_11 = arith.constant dense<0.000000e+00> : vector<16xf32>
    %29 = vector.multi_reduction <add>, %28, %cst_11 [1] : vector<16x64xf32> to vector<16xf32>
    %30 = vector.shape_cast %29 : vector<16xf32> to vector<16x1xf32>
    %cst_12 = arith.constant 9.99999996E-13 : f32
    %31 = vector.broadcast %cst_12 : f32 to vector<16x1xf32>
    %32 = arith.addf %30, %31 : vector<16x1xf32>
    %33 = math.rsqrt %32 : vector<16x1xf32>
    %34 = vector.broadcast %33 : vector<16x1xf32> to vector<16x64xf32>
    %35 = arith.mulf %22, %34 : vector<16x64xf32>
    %36 = vector.broadcast %33 : vector<16x1xf32> to vector<16x64xf32>
    %37 = arith.mulf %25, %36 : vector<16x64xf32>
    %38 = tpu.concatenate %35, %37 in 1 : vector<16x64xf32>, vector<16x64xf32> -> vector<16x128xf32>
    %c0_13 = arith.constant 0 : index
    %c0_14 = arith.constant 0 : index
    %39 = vector.load %arg6[%c0_13, %c0_14] : memref<128x128xf32, #tpu.memory_space<vmem>>, vector<128x128xf32>
    %cst_15 = arith.constant dense<0.000000e+00> : vector<16x128xf32>
    %40 = tpu.matmul %38, %39, %cst_15 {dimension_numbers = #tpu.dot_dimension_numbers<[1], [0], [0], [1], [0, 0, 1, 1], [], []>} : vector<16x128xf32>, vector<128x128xf32>, vector<16x128xf32> -> vector<16x128xf32>
    %c0_16 = arith.constant 0 : index
    %c0_17 = arith.constant 0 : index
    %41 = vector.load %arg18[%c0_16, %c0_17] : memref<16x128xf32, #tpu.memory_space<vmem>>, vector<16x128xf32>
    tpu.vector_store %arg18[%c0_16, %c0_17], %40 {strides = array<i32>} : memref<16x128xf32, #tpu.memory_space<vmem>>, vector<16x128xf32>,
    %c0_18 = arith.constant 0 : index
    %c0_19 = arith.constant 0 : index
    %42 = vector.load %arg19[%c0_18, %c0_19] : memref<16x64xf32, #tpu.memory_space<vmem>>, vector<16x64xf32>
    tpu.vector_store %arg19[%c0_18, %c0_19], %17 {strides = array<i32>} : memref<16x64xf32, #tpu.memory_space<vmem>>, vector<16x64xf32>,
    %43 = vector.extract_strided_slice %40 {offsets = [0, 0], sizes = [16, 64], strides = [1, 1]} : vector<16x128xf32> to vector<16x64xf32>
    %c0_20 = arith.constant 0 : index
    %c0_21 = arith.constant 0 : index
    %44 = vector.load %arg7[%c0_20, %c0_21] : memref<64x256xf32, #tpu.memory_space<vmem>>, vector<64x256xf32>
    %cst_22 = arith.constant dense<0.000000e+00> : vector<16x256xf32>
    %45 = tpu.matmul %43, %44, %cst_22 {dimension_numbers = #tpu.dot_dimension_numbers<[1], [0], [0], [1], [0, 0, 1, 1], [], []>} : vector<16x64xf32>, vector<64x256xf32>, vector<16x256xf32> -> vector<16x256xf32>
    %c0_23 = arith.constant 0 : index
    %c0_24 = arith.constant 0 : index
    %46 = vector.load %arg9[%c0_23, %c0_24] : memref<1x256xf32, #tpu.memory_space<vmem>>, vector<1x256xf32>
    %47 = vector.broadcast %46 : vector<1x256xf32> to vector<16x256xf32>
    %48 = arith.addf %45, %47 : vector<16x256xf32>
    %c0_25 = arith.constant 0 : index
    %c0_26 = arith.constant 0 : index
    %49 = vector.load %arg20[%c0_25, %c0_26] : memref<16x256xf32, #tpu.memory_space<vmem>>, vector<16x256xf32>
    tpu.vector_store %arg20[%c0_25, %c0_26], %48 {strides = array<i32>} : memref<16x256xf32, #tpu.memory_space<vmem>>, vector<16x256xf32>,
    %c0_27 = arith.constant 0 : index
    %c0_28 = arith.constant 0 : index
    %50 = vector.load %arg8[%c0_27, %c0_28] : memref<64x256xf32, #tpu.memory_space<vmem>>, vector<64x256xf32>
    %cst_29 = arith.constant dense<0.000000e+00> : vector<16x256xf32>
    %51 = tpu.matmul %43, %50, %cst_29 {dimension_numbers = #tpu.dot_dimension_numbers<[1], [0], [0], [1], [0, 0, 1, 1], [], []>} : vector<16x64xf32>, vector<64x256xf32>, vector<16x256xf32> -> vector<16x256xf32>
    %c0_30 = arith.constant 0 : index
    %c0_31 = arith.constant 0 : index
    %52 = vector.load %arg21[%c0_30, %c0_31] : memref<16x256xf32, #tpu.memory_space<vmem>>, vector<16x256xf32>
    tpu.vector_store %arg21[%c0_30, %c0_31], %51 {strides = array<i32>} : memref<16x256xf32, #tpu.memory_space<vmem>>, vector<16x256xf32>,
    %c0_32 = arith.constant 0 : index
    %c0_33 = arith.constant 0 : index
    %53 = vector.load %arg10[%c0_32, %c0_33] : memref<64x256xf32, #tpu.memory_space<vmem>>, vector<64x256xf32>
    %cst_34 = arith.constant dense<0.000000e+00> : vector<16x256xf32>
    %54 = tpu.matmul %43, %53, %cst_34 {dimension_numbers = #tpu.dot_dimension_numbers<[1], [0], [0], [1], [0, 0, 1, 1], [], []>} : vector<16x64xf32>, vector<64x256xf32>, vector<16x256xf32> -> vector<16x256xf32>
    %c0_35 = arith.constant 0 : index
    %c0_36 = arith.constant 0 : index
    %55 = vector.load %arg11[%c0_35, %c0_36] : memref<1x256xf32, #tpu.memory_space<vmem>>, vector<1x256xf32>
    %56 = vector.broadcast %55 : vector<1x256xf32> to vector<16x256xf32>
    %57 = arith.addf %54, %56 : vector<16x256xf32>
    %c0_37 = arith.constant 0 : index
    %c0_38 = arith.constant 0 : index
    %58 = vector.load %arg12[%c0_37, %c0_38] : memref<1x256xf32, #tpu.memory_space<vmem>>, vector<1x256xf32>
    %c0_39 = arith.constant 0 : index
    %c0_40 = arith.constant 0 : index
    %59 = vector.load %arg13[%c0_39, %c0_40] : memref<1x256xf32, #tpu.memory_space<vmem>>, vector<1x256xf32>
    %cst_41 = arith.constant dense<0.000000e+00> : vector<16xf32>
    %60 = vector.multi_reduction <add>, %57, %cst_41 [1] : vector<16x256xf32> to vector<16xf32>
    %61 = vector.shape_cast %60 : vector<16xf32> to vector<16x1xf32>
    %cst_42 = arith.constant 2.560000e+02 : f32
    %62 = vector.broadcast %cst_42 : f32 to vector<16x1xf32>
    %63 = arith.divf %61, %62 : vector<16x1xf32>
    %64 = vector.broadcast %63 : vector<16x1xf32> to vector<16x256xf32>
    %65 = arith.subf %57, %64 : vector<16x256xf32>
    %66 = arith.mulf %65, %65 : vector<16x256xf32>
    %cst_43 = arith.constant dense<0.000000e+00> : vector<16xf32>
    %67 = vector.multi_reduction <add>, %66, %cst_43 [1] : vector<16x256xf32> to vector<16xf32>
    %68 = vector.shape_cast %67 : vector<16xf32> to vector<16x1xf32>
    %cst_44 = arith.constant 2.560000e+02 : f32
    %69 = vector.broadcast %cst_44 : f32 to vector<16x1xf32>
    %70 = arith.divf %68, %69 : vector<16x1xf32>
    %cst_45 = arith.constant 9.99999974E-6 : f32
    %71 = vector.broadcast %cst_45 : f32 to vector<16x1xf32>
    %72 = arith.addf %70, %71 : vector<16x1xf32>
    %73 = math.rsqrt %72 : vector<16x1xf32>
    %74 = vector.broadcast %73 : vector<16x1xf32> to vector<16x256xf32>
    %75 = arith.mulf %65, %74 : vector<16x256xf32>
    %76 = vector.broadcast %58 : vector<1x256xf32> to vector<16x256xf32>
    %77 = arith.mulf %75, %76 : vector<16x256xf32>
    %78 = vector.broadcast %59 : vector<1x256xf32> to vector<16x256xf32>
    %79 = arith.addf %77, %78 : vector<16x256xf32>
    %cst_46 = arith.constant 5.000000e-01 : f32
    %80 = vector.broadcast %cst_46 : f32 to vector<16x256xf32>
    %81 = arith.mulf %80, %79 : vector<16x256xf32>
    %cst_47 = arith.constant 4.471500e-02 : f32
    %82 = vector.broadcast %cst_47 : f32 to vector<16x256xf32>
    %83 = arith.mulf %82, %79 : vector<16x256xf32>
    %84 = arith.mulf %83, %79 : vector<16x256xf32>
    %85 = arith.mulf %84, %79 : vector<16x256xf32>
    %86 = arith.addf %79, %85 : vector<16x256xf32>
    %cst_48 = arith.constant 0.797884583 : f32
    %87 = vector.broadcast %cst_48 : f32 to vector<16x256xf32>
    %88 = arith.mulf %87, %86 : vector<16x256xf32>
    %89 = math.tanh %88 : vector<16x256xf32>
    %cst_49 = arith.constant 1.000000e+00 : f32
    %90 = vector.broadcast %cst_49 : f32 to vector<16x256xf32>
    %91 = arith.addf %90, %89 : vector<16x256xf32>
    %92 = arith.mulf %81, %91 : vector<16x256xf32>
    %c0_50 = arith.constant 0 : index
    %c0_51 = arith.constant 0 : index
    %93 = vector.load %arg14[%c0_50, %c0_51] : memref<256x32xf32, #tpu.memory_space<vmem>>, vector<256x32xf32>
    %cst_52 = arith.constant dense<0.000000e+00> : vector<16x32xf32>
    %94 = tpu.matmul %92, %93, %cst_52 {dimension_numbers = #tpu.dot_dimension_numbers<[1], [0], [0], [1], [0, 0, 1, 1], [], []>} : vector<16x256xf32>, vector<256x32xf32>, vector<16x32xf32> -> vector<16x32xf32>
    %c0_53 = arith.constant 0 : index
    %c0_54 = arith.constant 0 : index
    %95 = vector.load %arg15[%c0_53, %c0_54] : memref<1x32xf32, #tpu.memory_space<vmem>>, vector<1x32xf32>
    %96 = vector.broadcast %95 : vector<1x32xf32> to vector<16x32xf32>
    %97 = arith.addf %94, %96 : vector<16x32xf32>
    %c0_55 = arith.constant 0 : index
    %c0_56 = arith.constant 0 : index
    %98 = vector.load %arg16[%c0_55, %c0_56] : memref<1x32xf32, #tpu.memory_space<vmem>>, vector<1x32xf32>
    %c0_57 = arith.constant 0 : index
    %c0_58 = arith.constant 0 : index
    %99 = vector.load %arg17[%c0_57, %c0_58] : memref<1x32xf32, #tpu.memory_space<vmem>>, vector<1x32xf32>
    %cst_59 = arith.constant dense<0.000000e+00> : vector<16xf32>
    %100 = vector.multi_reduction <add>, %97, %cst_59 [1] : vector<16x32xf32> to vector<16xf32>
    %101 = vector.shape_cast %100 : vector<16xf32> to vector<16x1xf32>
    %cst_60 = arith.constant 3.200000e+01 : f32
    %102 = vector.broadcast %cst_60 : f32 to vector<16x1xf32>
    %103 = arith.divf %101, %102 : vector<16x1xf32>
    %104 = vector.broadcast %103 : vector<16x1xf32> to vector<16x32xf32>
    %105 = arith.subf %97, %104 : vector<16x32xf32>
    %106 = arith.mulf %105, %105 : vector<16x32xf32>
    %cst_61 = arith.constant dense<0.000000e+00> : vector<16xf32>
    %107 = vector.multi_reduction <add>, %106, %cst_61 [1] : vector<16x32xf32> to vector<16xf32>
    %108 = vector.shape_cast %107 : vector<16xf32> to vector<16x1xf32>
    %cst_62 = arith.constant 3.200000e+01 : f32
    %109 = vector.broadcast %cst_62 : f32 to vector<16x1xf32>
    %110 = arith.divf %108, %109 : vector<16x1xf32>
    %cst_63 = arith.constant 9.99999974E-6 : f32
    %111 = vector.broadcast %cst_63 : f32 to vector<16x1xf32>
    %112 = arith.addf %110, %111 : vector<16x1xf32>
    %113 = math.rsqrt %112 : vector<16x1xf32>
    %114 = vector.broadcast %113 : vector<16x1xf32> to vector<16x32xf32>
    %115 = arith.mulf %105, %114 : vector<16x32xf32>
    %116 = vector.broadcast %98 : vector<1x32xf32> to vector<16x32xf32>
    %117 = arith.mulf %115, %116 : vector<16x32xf32>
    %118 = vector.broadcast %99 : vector<1x32xf32> to vector<16x32xf32>
    %119 = arith.addf %117, %118 : vector<16x32xf32>
    %c0_64 = arith.constant 0 : index
    %c0_65 = arith.constant 0 : index
    %120 = vector.load %arg22[%c0_64, %c0_65] : memref<16x32xf32, #tpu.memory_space<vmem>>, vector<16x32xf32>
    tpu.vector_store %arg22[%c0_64, %c0_65], %119 {strides = array<i32>} : memref<16x32xf32, #tpu.memory_space<vmem>>, vector<16x32xf32>,
    return
  }
  func.func @transform_0(%arg0: i32) -> (i32, i32) {
    %c0_i32 = arith.constant 0 : i32
    %c0_i32_0 = arith.constant 0 : i32
    return %arg0, %c0_i32 : i32, i32
  }
  func.func @transform_1(%arg0: i32) -> (i32, i32) {
    %c0_i32 = arith.constant 0 : i32
    %c0_i32_0 = arith.constant 0 : i32
    %c0_i32_1 = arith.constant 0 : i32
    return %c0_i32, %c0_i32_0 : i32, i32
  }
  func.func @transform_2(%arg0: i32) -> (i32, i32) {
    %c0_i32 = arith.constant 0 : i32
    %c0_i32_0 = arith.constant 0 : i32
    %c0_i32_1 = arith.constant 0 : i32
    return %c0_i32, %c0_i32_0 : i32, i32
  }
  func.func @transform_3(%arg0: i32) -> (i32, i32) {
    %c0_i32 = arith.constant 0 : i32
    %c0_i32_0 = arith.constant 0 : i32
    %c0_i32_1 = arith.constant 0 : i32
    return %c0_i32, %c0_i32_0 : i32, i32
  }
  func.func @transform_4(%arg0: i32) -> (i32, i32) {
    %c0_i32 = arith.constant 0 : i32
    %c0_i32_0 = arith.constant 0 : i32
    %c0_i32_1 = arith.constant 0 : i32
    return %c0_i32, %c0_i32_0 : i32, i32
  }
  func.func @transform_5(%arg0: i32) -> (i32, i32) {
    %c0_i32 = arith.constant 0 : i32
    %c0_i32_0 = arith.constant 0 : i32
    %c0_i32_1 = arith.constant 0 : i32
    return %c0_i32, %c0_i32_0 : i32, i32
  }
  func.func @transform_6(%arg0: i32) -> (i32, i32) {
    %c0_i32 = arith.constant 0 : i32
    %c0_i32_0 = arith.constant 0 : i32
    %c0_i32_1 = arith.constant 0 : i32
    return %c0_i32, %c0_i32_0 : i32, i32
  }
  func.func @transform_7(%arg0: i32) -> (i32, i32) {
    %c0_i32 = arith.constant 0 : i32
    %c0_i32_0 = arith.constant 0 : i32
    %c0_i32_1 = arith.constant 0 : i32
    return %c0_i32, %c0_i32_0 : i32, i32
  }
  func.func @transform_8(%arg0: i32) -> (i32, i32) {
    %c0_i32 = arith.constant 0 : i32
    %c0_i32_0 = arith.constant 0 : i32
    %c0_i32_1 = arith.constant 0 : i32
    return %c0_i32, %c0_i32_0 : i32, i32
  }
  func.func @transform_9(%arg0: i32) -> (i32, i32) {
    %c0_i32 = arith.constant 0 : i32
    %c0_i32_0 = arith.constant 0 : i32
    %c0_i32_1 = arith.constant 0 : i32
    return %c0_i32, %c0_i32_0 : i32, i32
  }
  func.func @transform_10(%arg0: i32) -> (i32, i32) {
    %c0_i32 = arith.constant 0 : i32
    %c0_i32_0 = arith.constant 0 : i32
    %c0_i32_1 = arith.constant 0 : i32
    return %c0_i32, %c0_i32_0 : i32, i32
  }
  func.func @transform_11(%arg0: i32) -> (i32, i32) {
    %c0_i32 = arith.constant 0 : i32
    %c0_i32_0 = arith.constant 0 : i32
    %c0_i32_1 = arith.constant 0 : i32
    return %c0_i32, %c0_i32_0 : i32, i32
  }
  func.func @transform_12(%arg0: i32) -> (i32, i32) {
    %c0_i32 = arith.constant 0 : i32
    %c0_i32_0 = arith.constant 0 : i32
    %c0_i32_1 = arith.constant 0 : i32
    return %c0_i32, %c0_i32_0 : i32, i32
  }
  func.func @transform_13(%arg0: i32) -> (i32, i32) {
    %c0_i32 = arith.constant 0 : i32
    %c0_i32_0 = arith.constant 0 : i32
    %c0_i32_1 = arith.constant 0 : i32
    return %c0_i32, %c0_i32_0 : i32, i32
  }
  func.func @transform_14(%arg0: i32) -> (i32, i32) {
    %c0_i32 = arith.constant 0 : i32
    %c0_i32_0 = arith.constant 0 : i32
    %c0_i32_1 = arith.constant 0 : i32
    return %c0_i32, %c0_i32_0 : i32, i32
  }
  func.func @transform_15(%arg0: i32) -> (i32, i32) {
    %c0_i32 = arith.constant 0 : i32
    %c0_i32_0 = arith.constant 0 : i32
    %c0_i32_1 = arith.constant 0 : i32
    return %c0_i32, %c0_i32_0 : i32, i32
  }
  func.func @transform_16(%arg0: i32) -> (i32, i32) {
    %c0_i32 = arith.constant 0 : i32
    %c0_i32_0 = arith.constant 0 : i32
    %c0_i32_1 = arith.constant 0 : i32
    return %c0_i32, %c0_i32_0 : i32, i32
  }
  func.func @transform_17(%arg0: i32) -> (i32, i32) {
    %c0_i32 = arith.constant 0 : i32
    %c0_i32_0 = arith.constant 0 : i32
    return %arg0, %c0_i32 : i32, i32
  }
  func.func @transform_18(%arg0: i32) -> (i32, i32) {
    %c0_i32 = arith.constant 0 : i32
    %c0_i32_0 = arith.constant 0 : i32
    return %arg0, %c0_i32 : i32, i32
  }
  func.func @transform_19(%arg0: i32) -> (i32, i32) {
    %c0_i32 = arith.constant 0 : i32
    %c0_i32_0 = arith.constant 0 : i32
    return %arg0, %c0_i32 : i32, i32
  }
  func.func @transform_20(%arg0: i32) -> (i32, i32) {
    %c0_i32 = arith.constant 0 : i32
    %c0_i32_0 = arith.constant 0 : i32
    return %arg0, %c0_i32 : i32, i32
  }
  func.func @transform_21(%arg0: i32) -> (i32, i32) {
    %c0_i32 = arith.constant 0 : i32
    %c0_i32_0 = arith.constant 0 : i32
    return %arg0, %c0_i32 : i32, i32
  }
}

</mosaic_0001>

<bundles_post_ra>
// kernel: tpu_custom_call.1
= control target key start
LH: loop header
LB: loop body
LE: loop exit
PB: predicated region body
PF: predicated region fallthrough
CT: control target
= control target key end

     0   :  { %s2626_s0 = inlined_call_operand.hbm [shape: f32[16,32], index: 0, kind: input, shape index: {}]   ;;  %s2627_s1 = inlined_call_operand.vmem [shape: f32[32,192], index: 1, kind: input, shape index: {}]   ;;  %s2628_s2 = inlined_call_operand.vmem [shape: f32[1,192], index: 2, kind: input, shape index: {}]   ;;  %s2629_s3 = inlined_call_operand.hbm [shape: f32[64,64], index: 3, kind: input, shape index: {}]   ;;  %s2630_s4 = inlined_call_operand.hbm [shape: f32[1,64], index: 4, kind: input, shape index: {}]   ;;  %s2631_s5 = inlined_call_operand.vmem [shape: f32[128,128], index: 5, kind: input, shape index: {}]   ;;  %s2632_s6 = inlined_call_operand.vmem [shape: f32[64,256], index: 6, kind: input, shape index: {}]   ;;  %s2633_s7 = inlined_call_operand.hbm [shape: f32[64,256], index: 7, kind: input, shape index: {}]   ;;  %s2634_s8 = inlined_call_operand.vmem [shape: f32[1,256], index: 8, kind: input, shape index: {}]   ;;  %s2635_s9 = inlined_call_operand.hbm [shape: f32[64,256], index: 9, kind: input, shape index: {}]   ;;  %s2636_s10 = inlined_call_operand.vmem [shape: f32[1,256], index: 10, kind: input, shape index: {}]   ;;  %s2637_s11 = inlined_call_operand.vmem [shape: f32[1,256], index: 11, kind: input, shape index: {}]   ;;  %s2638_s12 = inlined_call_operand.vmem [shape: f32[1,256], index: 12, kind: input, shape index: {}]   ;;  %s2639_s13 = inlined_call_operand.vmem [shape: f32[256,32], index: 13, kind: input, shape index: {}]   ;;  %s2640_s14 = inlined_call_operand.vmem [shape: f32[1,32], index: 14, kind: input, shape index: {}]   ;;  %s2641_s15 = inlined_call_operand.vmem [shape: f32[1,32], index: 15, kind: input, shape index: {}]   ;;  %s2642_s16 = inlined_call_operand.vmem [shape: f32[1,32], index: 16, kind: input, shape index: {}]   ;;  %s2643_s17 = inlined_call_operand.hbm [shape: f32[16,128], index: 17, kind: output, shape index: {0}]   ;;  %s2644_s18 = inlined_call_operand.hbm [shape: f32[16,64], index: 18, kind: output, shape index: {1}]   ;;  %s2645_s19 = inlined_call_operand.hbm [shape: f32[16,256], index: 19, kind: output, shape index: {2}]   ;;  %s2646_s20 = inlined_call_operand.hbm [shape: f32[16,256], index: 20, kind: output, shape index: {3}]   ;;  %s2647_s21 = inlined_call_operand.hbm [shape: f32[16,32], index: 21, kind: output, shape index: {4}]  }
   0x1   :  { %2652 = sst [smem:[#allocation24_spill]] %s2626_s0 }
   0x2   :  { %2653 = sst [smem:[#allocation25_spill]] %s2627_s1 }
   0x3   :  { %2654 = sst [smem:[#allocation26_spill]] %s2628_s2 }
   0x4   :  { %2655 = sst [smem:[#allocation27_spill]] %s2629_s3 }
   0x5   :  { %2656 = sst [smem:[#allocation28_spill]] %s2630_s4 }
   0x6   :  { %2657 = sst [smem:[#allocation29_spill]] %s2631_s5 }
   0x7   :  { %27 = vsyncpa [#allocation3], 0 }
   0x8   :  { %28 = vsyncpa [#allocation6], 0 }
   0x9   :  { %29 = vsyncpa [#allocation9], 0 }
   0xa   :  { %30 = vsyncpa [#allocation4], 0 }
   0xb   :  { %31 = vsyncpa [#allocation13], 0 }
   0xc   :  { %32 = vsyncpa [#allocation16], 0  ;;  %s2021_s2 = smov [#allocation5]   ;;  %s2022_s26 = smov [#allocation8]  }
   0xd   :  { %s54_s25 = sshll.u32 %s2021_s2, 4  ;;  %s80_s27 = sshll.u32 %s2022_s26, 4  ;;  %s55_s25 = int_to_ptr.vmem [resolvable:$true] %s54_s25  ;;  %s81_s27 = int_to_ptr.vmem [resolvable:$true] %s80_s27 }
   0xe   :  { %s1817_s3 = scalar_lea.vmem %s55_s25, 1024  ;;  %p1822_p1 = scmp.lt.s32.totalorder %s55_s25, %s55_s25 }
   0xf   :  { %p1818_p0 = scmp.ne.s32.totalorder %s55_s25, %s1817_s3  ;;  %p1823_p2 = scmp.lt.s32.totalorder %s1817_s3, %s1817_s3 }
  0x11   :  { %p1824_p3 = por %p1823_p2, %p1822_p1 }
  0x13   :  { %p1825_p4 = pnand %p1824_p3, %p1818_p0 }
  0x15   :  { %1828 = shalt.err (!%p1825_p4)
}
  0x16   :  { %s2023_s28 = smov 128   ;;  %s2024_s29 = smov 8  }
  0x17   :  { %s2658_s30 = sld [smem:[#allocation27_spill]]  ;;  %s1837_s5 = scalar_lea.vmem %s81_s27, 2048 }
  0x18   :  { %p1838_p5 = scmp.ne.s32.totalorder %s81_s27, %s1837_s5  ;;  %p1842_p6 = scmp.lt.s32.totalorder %s81_s27, %s81_s27 }
  0x19   :  { %p1843_p7 = scmp.lt.s32.totalorder %s1837_s5, %s1837_s5 }
  0x1b   :  { %p1844_p8 = por %p1843_p7, %p1842_p6 }
  0x1d   :  { %60 = dma.hbm_to_vmem [thread:$0]  %s2658_s30, 1024, %s55_s25, [#allocation6], %s2023_s28, %s2023_s28, %s2024_s29  }
  0x1e   :  { %p1845_p9 = pnand %p1844_p8, %p1838_p5 }
  0x20   :  { %1848 = shalt.err (!%p1845_p9)
}
  0x21   :  { %s2650_s22 = smov 256   ;;  %s2026_s23 = smov 16  }
  0x22   :  { %86 = dma.hbm_to_vmem [thread:$0]  %s2633_s7, 2048, %s81_s27, [#allocation9], %s2650_s22, %s2650_s22, %s2026_s23  }
  0x23   :  { %s2027_s2 = smov [#allocation2]   ;;  %s2028_s3 = smov [#allocation7]  }
  0x24   :  { %s38_s26 = sshll.u32 %s2027_s2, 4  ;;  %s67_s25 = sshll.u32 %s2028_s3, 4  ;;  %s39_s26 = int_to_ptr.vmem [resolvable:$true] %s38_s26  ;;  %s68_s25 = int_to_ptr.vmem [resolvable:$true] %s67_s25 }
  0x25   :  { %s1857_s0 = scalar_lea.vmem %s39_s26, 256  ;;  %p1862_p11 = scmp.lt.s32.totalorder %s39_s26, %s39_s26 }
  0x26   :  { %p1858_p10 = scmp.ne.s32.totalorder %s39_s26, %s1857_s0  ;;  %p1863_p12 = scmp.lt.s32.totalorder %s1857_s0, %s1857_s0 }
  0x28   :  { %p1864_p13 = por %p1863_p12, %p1862_p11 }
  0x2a   :  { %p1865_p0 = pnand %p1864_p13, %p1858_p10 }
  0x2c   :  { %1868 = shalt.err (!%p1865_p0)
}
  0x2d   :  { %s2659_s5 = sld [smem:[#allocation24_spill]]  ;;  %s1877_s7 = scalar_lea.vmem %s68_s25, 16 }
  0x2e   :  { %p1878_p1 = scmp.ne.s32.totalorder %s68_s25, %s1877_s7  ;;  %s1881_s27 = scalar_lea.vmem %s68_s25, 32 }
  0x2f   :  { %p1882_p2 = scmp.lt.s32.totalorder %s68_s25, %s68_s25  ;;  %p1883_p3 = scmp.lt.s32.totalorder %s1881_s27, %s1877_s7 }
  0x31   :  { %p1884_p4 = por %p1883_p3, %p1882_p2 }
  0x33   :  { %44 = dma.hbm_to_vmem [thread:$0]  %s2659_s5, 256, %s39_s26, [#allocation3], %s2023_s28, %s2023_s28, %s2024_s29  }
  0x34   :  { %p1885_p5 = pnand %p1884_p4, %p1878_p1 }
  0x36   :  { %1888 = shalt.err (!%p1885_p5)
}
  0x37   :  { %s2660_s2 = sld [smem:[#allocation28_spill]]  ;;  %s2029_s3 = smov [#allocation10]  }
  0x38   :  { %s94_s0 = sshll.u32 %s2029_s3, 4  ;;  %s95_s0 = int_to_ptr.vmem [resolvable:$true] %s94_s0 }
  0x39   :  { %s1897_s22 = scalar_lea.vmem %s95_s0, 2048  ;;  %p1902_p7 = scmp.lt.s32.totalorder %s95_s0, %s95_s0 }
  0x3a   :  { %p1898_p6 = scmp.ne.s32.totalorder %s95_s0, %s1897_s22  ;;  %p1903_p8 = scmp.lt.s32.totalorder %s1897_s22, %s1897_s22 }
  0x3c   :  { %p1904_p9 = por %p1903_p8, %p1902_p7 }
  0x3d   :  { %70 = dma.hbm_to_vmem [thread:$0]  %s2660_s2, 16, %s68_s25, [#allocation6]  }
  0x3e   :  { %p1905_p10 = pnand %p1904_p9, %p1898_p6 }
  0x40   :  { %1908 = shalt.err (!%p1905_p10)
}
  0x41   :  { %s2661_s26 = smov 256  }
  0x42   :  { %100 = dma.hbm_to_vmem [thread:$0]  %s2635_s9, 2048, %s95_s0, [#allocation9], %s2661_s26, %s2661_s26, %s2026_s23  }
  0x43   :  { %2009 = dma.done.wait [#allocation3], 256  }
  0x44   :  { %2010 = vsyncadd [#allocation3], 4294967040 }
  0x45   :  { %2011 = dma.done.wait [#allocation6], 1040  }
  0x46   :  { %2012 = vsyncadd [#allocation6], 4294966256 }
  0x47   :  { %2013 = dma.done.wait [#allocation9], 4096  }
  0x48   :  { %2014 = vsyncadd [#allocation9], 4294963200  ;;  %v2030_v0 = vmov 0.0   ;;  %s2662_s5 = sld [smem:[#allocation25_spill]]  ;;  %v130_v9 = vld [vmem:[#allocation2] sm:$0xff]  ;;  %vm152_vm0 = vcmask 261120   ;;  %v142_v19 = vlaneseq }
  0x49   :  { %223 = vmatprep.mubr.f32.mxu0 %v2030_v0  ;;  %1022 = vmatprep.mubr.f32.mxu1 %v2030_v0  ;;  %v131_v10 = vld [vmem:[#allocation2 + $0x8] sm:$0xff]  ;;  %v246_v12 = vld [vmem:[#allocation5 + $0x30] sm:$0xff]  ;;  %v245_v13 = vld [vmem:[#allocation5 + $0x28] sm:$0xff]  ;;  %s2663_s1 = sld [smem:[#allocation26_spill]]  ;;  %vm255_vm1 = vcmask 523264   ;;  %s2037_s24 = smov 64  }
  0x4a   :  { %v247_v11 = vld [vmem:[#allocation5 + $0x38] sm:$0xff]  ;;  %v244_v14 = vld [vmem:[#allocation5 + $0x20] sm:$0xff]  ;;  %v242_v16 = vld [vmem:[#allocation5 + $0x10] sm:$0xff]  ;;  %v2209_v20 = vshrl.u32 %v142_v19, 7  ;;  %v2031_v61 = vmov 683565275  }
  0x4b   :  { %v243_v15 = vld [vmem:[#allocation5 + $0x18] sm:$0xff]  ;;  %v241_v17 = vld [vmem:[#allocation5 + $0x8] sm:$0xff]  ;;  %v240_v18 = vld [vmem:[#allocation5] sm:$0xff]  ;;  %v2032_v63 = vmov 2475754826   ;;  %s2664_s0 = sld [smem:[#allocation29_spill]] }
  0x4c   :  { %v2212_v21 = vsub.s32 1, %v2209_v20  ;;  %v1586_v32 = vld [vmem:[#allocation7] ss:$0 sm:$0xff] }
  0x4e   :  { %v139_v1 = vld [vmem:[%s2662_s5 + $0x38] sm:$0xff]  ;;  %v138_v2 = vld [vmem:[%s2662_s5 + $0x30] sm:$0xff]  ;;  %v137_v3 = vld [vmem:[%s2662_s5 + $0x28] sm:$0xff] }
  0x4f   :  { %183 = vmatprep.subr.mxu0 %v139_v1  ;;  %v136_v4 = vld [vmem:[%s2662_s5 + $0x20] sm:$0xff]  ;;  %v135_v5 = vld [vmem:[%s2662_s5 + $0x18] sm:$0xff]  ;;  %v134_v6 = vld [vmem:[%s2662_s5 + $0x10] sm:$0xff] }
  0x50   :  { %184 = vmatpush1.msra.mxu0 %v138_v2  ;;  %v133_v7 = vld [vmem:[%s2662_s5 + $0x8] sm:$0xff]  ;;  %v132_v8 = vld [vmem:[%s2662_s5] sm:$0xff]  ;;  %v2033_v2 = vmov 2131351028  }
  0x51   :  { %185 = vmatprep.subr.mxu0 %v137_v3  ;;  %v2217_v22 = vld [vmem:[%s2663_s1] sm:$0x3]  ;;  %s2039_s1 = smov [#allocation15]  }
  0x52   :  { %186 = vmatpush1.msra.mxu0 %v136_v4  ;;  %v149_v23 = vrot.slane %v2217_v22, %v2212_v21  ;;  %s1544_s2 = sshll.u32 %s2039_s1, 4  ;;  %s1545_s2 = int_to_ptr.vmem [resolvable:$true] %s1544_s2 }
  0x53   :  { %187 = vmatprep.subr.mxu0 %v135_v5 }
  0x54   :  { %188 = vmatpush1.msra.mxu0 %v134_v6 }
  0x55   :  { %189 = vmatprep.subr.mxu0 %v133_v7  ;;  %v2034_v7 = vmov 2102212464  }
  0x56   :  { %190 = vmatpush1.msra.mxu0 %v132_v8 }
  0x57   :  { %1584 = vmatmul.mubr.msk.f32.vlgmr.msra.gmra.mxu0 %vm152_vm0, %v130_v9  ;;  %1680 = vmatprep.subr.mxu0 %v247_v11  ;;  %v2035_v9 = vmov 920167782  }
  0x58   :  { %229 = vmatprep.mubr.f32.mxu0 %v2030_v0  ;;  %1681 = vmatpush3.msra.mxu0 %v247_v11 }
  0x59   :  { %1682 = vmatprep.subr.mxu0 %v246_v12 }
  0x5a   :  { %1683 = vmatpush3.msra.mxu0 %v246_v12 }
  0x5b   :  { %1585 = vmatmul.mubr.msk.f32.gmra.mxu0 %vm152_vm0, %v131_v10  ;;  %1684 = vmatprep.subr.mxu0 %v245_v13 }
  0x5c   :  { %1685 = vmatpush3.msra.mxu0 %v245_v13 }
  0x5d   :  { %1686 = vmatprep.subr.mxu0 %v244_v14 }
  0x5e   :  { %1687 = vmatpush3.msra.mxu0 %v244_v14  ;;  %v2036_v14 = vmov 1326507024  }
  0x5f   :  { %1688 = vmatprep.subr.mxu0 %v243_v15 }
  0x60   :  { %1689 = vmatpush3.msra.mxu0 %v243_v15 }
  0x61   :  { %1690 = vmatprep.subr.mxu0 %v242_v16 }
  0x62   :  { %1691 = vmatpush3.msra.mxu0 %v242_v16 }
  0x63   :  { %1692 = vmatprep.subr.mxu0 %v241_v17 }
  0x64   :  { %1693 = vmatpush3.msra.mxu0 %v241_v17 }
  0x65   :  { %1694 = vmatprep.subr.mxu0 %v240_v18 }
  0x66   :  { %1695 = vmatpush3.msra.mxu0 %v240_v18 }
 0x117   :  { %v2221_v24 = vpop.f32.mrf.mxu0 }
 0x119   :  { %v227_v25 = vpop.f32.mrf.mxu0 }
 0x11a   :  { %v228_v26 = vadd.f32 %v227_v25, %v149_v23 }
 0x11b   :  { %v2223_v27 = vpop.f32.mrf.mxu0 }
 0x11c   :  { %1769 = vtanh.f32 %v228_v26 }
 0x11d   :  { %v233_v28 = vpop.f32.mrf.mxu0 }
 0x11e   :  { %v234_v29 = vadd.f32 %v233_v28, %v149_v23 }
 0x120   :  { %1771 = vtanh.f32 %v234_v29 }
 0x129   :  { %v1770_v30 = vpop.eup %1769 }
 0x12a   :  { %1696 = vmatprep.mubr.msk.f32.mxu0 %vm255_vm1, %v1770_v30 }
 0x12d   :  { %v1772_v31 = vpop.eup %1771 }
 0x12e   :  { %1697 = vmatmul.mubr.msk.f32.vlgmr.msra.gmra.mxu0 %vm255_vm1, %v1772_v31 }
 0x1ee   :  { %v1698_v33 = vpop.f32.mrf.mxu0 }
 0x1ef   :  { %v334_v34 = vadd.f32 %v1698_v33, %v1586_v32 }
 0x1f0   :  { %v328_v35 = vpop.f32.mrf.mxu0 }
 0x1f1   :  { %1773 = vtanh.f32 %v334_v34  ;;  %v329_v36 = vadd.f32 %v1586_v32, %v328_v35 }
 0x1f3   :  { %1775 = vtanh.f32 %v329_v36 }
 0x1fe   :  { %v1774_v37 = vpop.eup %1773 }
 0x1ff   :  { %v2227_v38 = vmul.f32 3.1415927, %v1774_v37 }
 0x200   :  { %v1776_v39 = vpop.eup %1775 }
 0x201   :  { %v447_v40 = vand.u32 2139095040, %v2227_v38  ;;  %923 = vst.msk [vmem:[#allocation12 + $0x8] sm:$0xff] %vm255_vm1, %v2227_v38  ;;  %v2232_v41 = vmul.f32 3.1415927, %v1776_v39  ;;  %v444_v42 = vand.u32 2147483647, %v2227_v38 }
 0x203   :  { %v448_v43 = vshrl.u32 %v447_v40, 23  ;;  %v344_v44 = vand.u32 2139095040, %v2232_v41  ;;  %922 = vst.msk [vmem:[#allocation12] sm:$0xff] %vm255_vm1, %v2232_v41  ;;  %v451_v47 = vand.u32 8388607, %v444_v42 }
 0x204   :  { %v341_v48 = vand.u32 2147483647, %v2232_v41 }
 0x205   :  { %v1593_v45 = vadd.s32 4294967169, %v448_v43  ;;  %v345_v46 = vshrl.u32 %v344_v44, 23  ;;  %v452_v52 = vor.u32 8388608, %v451_v47 }
 0x206   :  { %v348_v54 = vand.u32 8388607, %v341_v48 }
 0x207   :  { %v454_v49 = vadd.s32 1, %v1593_v45  ;;  %v1589_v50 = vadd.s32 4294967169, %v345_v46  ;;  %v2243_v60 = vshll.u32 %v452_v52, 8 }
 0x208   :  { %v349_v4 = vor.u32 8388608, %v348_v54 }
 0x209   :  { %vm455_vm2 = vcmp.gt.s32.totalorder %v454_v49, 0  ;;  %v351_v51 = vadd.s32 1, %v1589_v50 }
 0x20a   :  { %v456_v53 = vsel %vm455_vm2, %v454_v49, 0  ;;  %v389_v43 = vshll.u32 %v349_v4, 8  ;;  %vm446_vm2 = vcmp.lt.s32.totalorder %v2227_v38, 0 }
 0x20b   :  { %v458_v55 = vand.u32 31, %v456_v53  ;;  %vm352_vm3 = vcmp.gt.s32.totalorder %v351_v51, 0  ;;  %v457_v57 = vshrl.u32 %v456_v53, 5 }
 0x20c   :  { %v353_v56 = vsel %vm352_vm3, %v351_v51, 0  ;;  %vm445_vm3 = vcmp.le.f32.partialorder %v444_v42, 0.7853982 }
 0x20d   :  { %v459_v58 = vsub.s32 32, %v458_v55  ;;  %v355_v59 = vand.u32 31, %v353_v56  ;;  %v461_v62 = vshll.u32 %v2031_v61, %v458_v55  ;;  %v464_v1 = vshll.u32 %v2032_v63, %v458_v55 }
 0x20e   :  { %v467_v3 = vshll.u32 %v2033_v2, %v458_v55  ;;  %v470_v8 = vshll.u32 %v2034_v7, %v458_v55  ;;  %v473_v10 = vshll.u32 %v2035_v9, %v458_v55  ;;  %vm476_vm4 = vcmp.lt.s32.totalorder %v457_v57, 1 }
 0x20f   :  { %v462_v5 = vshrl.u32 %v2032_v63, %v459_v58  ;;  %v465_v6 = vshrl.u32 %v2033_v2, %v459_v58  ;;  %v356_v11 = vsub.s32 32, %v355_v59  ;;  %v468_v12 = vshrl.u32 %v2034_v7, %v459_v58 }
 0x210   :  { %v471_v13 = vshrl.u32 %v2035_v9, %v459_v58  ;;  %v474_v15 = vshrl.u32 %v2036_v14, %v459_v58  ;;  %v460_v16 = vshrl.u32 %v2031_v61, %v459_v58  ;;  %vm477_vm5 = vcmp.lt.s32.totalorder %v457_v57, 2 }
 0x211   :  { %v463_v17 = vor.u32 %v462_v5, %v461_v62  ;;  %v466_v18 = vor.u32 %v465_v6, %v464_v1  ;;  %v469_v19 = vor.u32 %v468_v12, %v467_v3  ;;  %vm478_vm6 = vcmp.lt.s32.totalorder %v457_v57, 3 }
 0x212   :  { %v472_v23 = vor.u32 %v471_v13, %v470_v8  ;;  %v475_v25 = vor.u32 %v474_v15, %v473_v10  ;;  %vm479_vm7 = vcmp.lt.s32.totalorder %v457_v57, 4  ;;  %v359_v36 = vshrl.u32 %v2032_v63, %v356_v11 }
 0x213   :  { %v480_v26 = vsel %vm476_vm4, %v460_v16, %v463_v17  ;;  %v484_v28 = vsel %vm476_vm4, %v463_v17, %v466_v18  ;;  %v481_v29 = vsel %vm479_vm7, %v469_v19, 2102212464  ;;  %v488_v31 = vsel %vm476_vm4, %v466_v18, %v469_v19 }
 0x214   :  { %v485_v30 = vsel %vm479_vm7, %v472_v23, 920167782  ;;  %v489_v32 = vsel %vm479_vm7, %v475_v25, 1326507024  ;;  %v482_v33 = vsel %vm478_vm6, %v466_v18, %v481_v29  ;;  %v358_v40 = vshll.u32 %v2031_v61, %v355_v59 }
 0x215   :  { %v486_v34 = vsel %vm478_vm6, %v469_v19, %v485_v30  ;;  %v490_v35 = vsel %vm478_vm6, %v472_v23, %v489_v32  ;;  %v354_v49 = vshrl.u32 %v353_v56, 5  ;;  %v483_v50 = vsel %vm477_vm5, %v480_v26, %v482_v33 }
 0x216   :  { %v487_v37 = vsel %vm477_vm5, %v484_v28, %v486_v34  ;;  %v491_v39 = vsel %vm477_vm5, %v488_v31, %v490_v35  ;;  %v361_v51 = vshll.u32 %v2032_v63, %v355_v59  ;;  %v362_v52 = vshrl.u32 %v2033_v2, %v356_v11 }
 0x217   :  { %v2251_v44 = vmul.u32.u64.low %v2243_v60, %v491_v39  ;;  %v2252_v45 = vmul.u32.u64.high %v2243_v60, %v491_v39, %v2251_v44  ;;  %v2255_v46 = vmul.u32.u64.low %v2243_v60, %v487_v37  ;;  %v2256_v47 = vmul.u32.u64.high %v2243_v60, %v487_v37, %v2255_v46 }
 0x218   :  { %v360_v53 = vor.u32 %v359_v36, %v358_v40  ;;  %v364_v54 = vshll.u32 %v2033_v2, %v355_v59  ;;  %v365_v55 = vshrl.u32 %v2034_v7, %v356_v11  ;;  %v368_v58 = vshrl.u32 %v2035_v9, %v356_v11 }
 0x219   :  { %v363_v62 = vor.u32 %v362_v52, %v361_v51  ;;  %v367_v1 = vshll.u32 %v2034_v7, %v355_v59  ;;  %v370_v3 = vshll.u32 %v2035_v9, %v355_v59  ;;  %v371_v4 = vshrl.u32 %v2036_v14, %v356_v11 }
 0x21a   :  { %v499_v5 = vmul.u32 %v2243_v60, %v483_v50  ;;  %vm501_vm8 = vc.u32 %v2252_v45, %v2255_v46  ;;  %v502_v6 = vadd.s32 1, %v2256_v47  ;;  %v366_v56 = vor.u32 %v365_v55, %v364_v54 }
 0x21b   :  { %v369_v57 = vor.u32 %v368_v58, %v367_v1  ;;  %v372_v8 = vor.u32 %v371_v4, %v370_v3  ;;  %vm373_vm9 = vcmp.lt.s32.totalorder %v354_v49, 1  ;;  %vm376_vm10 = vcmp.lt.s32.totalorder %v354_v49, 4 }
 0x21c   :  { %v503_v63 = vsel %vm501_vm8, %v502_v6, %v2256_v47  ;;  %v357_v2 = vshrl.u32 %v2031_v61, %v356_v11  ;;  %v378_v10 = vsel %vm376_vm10, %v366_v56, 2102212464  ;;  %v381_v7 = vsel %vm373_vm9, %v360_v53, %v363_v62 }
 0x21d   :  { %v504_v59 = vadd.s32 %v503_v63, %v499_v5  ;;  %vm375_vm11 = vcmp.lt.s32.totalorder %v354_v49, 3  ;;  %v382_v9 = vsel %vm376_vm10, %v369_v57, 920167782  ;;  %v385_v60 = vsel %vm373_vm9, %v363_v62, %v366_v56 }
 0x21e   :  { %vm374_vm12 = vcmp.lt.s32.totalorder %v354_v49, 2  ;;  %v377_v12 = vsel %vm373_vm9, %v357_v2, %v360_v53  ;;  %v383_v13 = vsel %vm375_vm11, %v366_v56, %v382_v9  ;;  %v386_v14 = vsel %vm376_vm10, %v372_v8, 1326507024 }
 0x21f   :  { %v505_v15 = vadd.s32 536870912, %v504_v59  ;;  %v379_v16 = vsel %vm375_vm11, %v363_v62, %v378_v10  ;;  %v384_v17 = vsel %vm374_vm12, %v381_v7, %v383_v13  ;;  %v387_v18 = vsel %vm375_vm11, %v369_v57, %v386_v14 }
 0x220   :  { %v388_v19 = vsel %vm374_vm12, %v385_v60, %v387_v18  ;;  %v2266_v23 = vmul.u32.u64.low %v389_v43, %v384_v17  ;;  %v2267_v25 = vmul.u32.u64.high %v389_v43, %v384_v17, %v2266_v23  ;;  %v380_v28 = vsel %vm374_vm12, %v377_v12, %v379_v16 }
 0x221   :  { %v506_v26 = vshrl.u32 %v505_v15, 30  ;;  %v2269_v61 = vmul.u32.u64.low %v389_v43, %v388_v19  ;;  %v2270_v11 = vmul.u32.u64.high %v389_v43, %v388_v19, %v2269_v61  ;;  %v396_v32 = vmul.u32 %v389_v43, %v380_v28 }
 0x222   :  { %v399_v30 = vadd.s32 1, %v2267_v25  ;;  %v500_v51 = vadd.s32 %v2255_v46, %v2252_v45  ;;  %vm343_vm4 = vcmp.lt.s32.totalorder %v2232_v41, 0  ;;  %vm342_vm5 = vcmp.le.f32.partialorder %v341_v48, 0.7853982 }
 0x223   :  { %v507_v29 = vshll.u32 %v506_v26, 30  ;;  %vm398_vm13 = vc.u32 %v2270_v11, %v2266_v23  ;;  %v397_v2 = vadd.s32 %v2266_v23, %v2270_v11  ;;  %v530_v7 = vsub.s32 4, %v506_v26 }
 0x224   :  { %v400_v33 = vsel %vm398_vm13, %v399_v30, %v2267_v25  ;;  %vm536_vm11 = vweird.f32 %v2227_v38 }
 0x225   :  { %v508_v31 = vsub.s32 %v504_v59, %v507_v29  ;;  %v401_v35 = vadd.s32 %v400_v33, %v396_v32  ;;  %v531_v16 = vsel %vm446_vm2, %v530_v7, %v506_v26 }
 0x226   :  { %v533_v23 = vsel %vm445_vm3, 0, %v531_v16 }
 0x227   :  { %v510_v34 = vsub.s32 0, %v508_v31  ;;  %v402_v37 = vadd.s32 536870912, %v401_v35  ;;  %v744_v61 = vadd.s32 3, %v533_v23 }
 0x229   :  { %v1594_v36 = vmin.u32 %v510_v34, %v508_v31  ;;  %v403_v40 = vshrl.u32 %v402_v37, 30  ;;  %v745_v30 = vand.u32 3, %v744_v61 }
 0x22b   :  { %v512_v39 = vclz %v1594_v36  ;;  %v404_v47 = vshll.u32 %v403_v40, 30  ;;  %v427_v28 = vsub.s32 4, %v403_v40  ;;  %vm750_vm6 = vcmp.eq.s32.totalorder %v745_v30, 2 }
 0x22c   :  { %vm747_vm7 = vcmp.eq.s32.totalorder %v745_v30, 0  ;;  %vm746_vm10 = vcmp.lt.s32.totalorder %v745_v30, 2 }
 0x22d   :  { %v1595_v44 = vadd.s32 4294967294, %v512_v39  ;;  %v405_v50 = vsub.s32 %v401_v35, %v404_v47  ;;  %v428_v26 = vsel %vm343_vm4, %v427_v28, %v403_v40 }
 0x22e   :  { %v430_v36 = vsel %vm342_vm5, 0, %v428_v26 }
 0x22f   :  { %vm1596_vm14 = vcmp.lt.s32.totalorder %v1595_v44, 0  ;;  %v407_v53 = vsub.s32 0, %v405_v50  ;;  %v640_v40 = vadd.s32 3, %v430_v36 }
 0x230   :  { %v515_v49 = vsel %vm1596_vm14, 0, %v1595_v44 }
 0x231   :  { %v516_v52 = vsub.s32 32, %v515_v49  ;;  %v520_v43 = vsub.s32 4294967266, %v515_v49  ;;  %v517_v54 = vshll.u32 %v508_v31, %v515_v49  ;;  %v1590_v62 = vmin.u32 %v407_v53, %v405_v50 }
 0x232   :  { %v537_v31 = vand.u32 3, %v533_v23 }
 0x233   :  { %v518_v55 = vshrl.u32 %v500_v51, %v516_v52  ;;  %v521_v58 = vadd.s32 127, %v520_v43  ;;  %v409_v4 = vclz %v1590_v62  ;;  %v641_v51 = vand.u32 3, %v640_v40  ;;  %v834_v40 = vld [vmem:[%s2664_s0 + $0x28] sm:$0xff] }
 0x234   :  { %vm539_vm8 = vcmp.eq.s32.totalorder %v537_v31, 0  ;;  %vm542_vm9 = vcmp.eq.s32.totalorder %v537_v31, 2  ;;  %vm538_vm12 = vcmp.lt.s32.totalorder %v537_v31, 2  ;;  %v434_v43 = vand.u32 3, %v430_v36  ;;  %v840_v36 = vld [vmem:[%s2664_s0 + $0x58] sm:$0xff] }
 0x235   :  { %v519_v1 = vor.u32 %v518_v55, %v517_v54  ;;  %v522_v3 = vshll.u32 %v521_v58, 23  ;;  %v1591_v6 = vadd.s32 4294967294, %v409_v4  ;;  %vm646_vm13 = vcmp.eq.s32.totalorder %v641_v51, 2 }
 0x236   :  { %vm643_vm14 = vcmp.eq.s32.totalorder %v641_v51, 0 }
 0x237   :  { %v523_v5 = vor.u32 4788187, %v522_v3  ;;  %v526_v57 = vcvt.s32.f32 %v519_v1  ;;  %vm1592_vm15 = vcmp.lt.s32.totalorder %v1591_v6, 0 }
 0x238   :  { %v412_v63 = vsel %vm1592_vm15, 0, %v1591_v6  ;;  %vm436_vm15 = vcmp.eq.s32.totalorder %v434_v43, 0 }
 0x239   :  { %v524_v56 = vand.u32 2147483647, %v523_v5  ;;  %v413_v45 = vsub.s32 32, %v412_v63  ;;  %v417_v46 = vsub.s32 4294967266, %v412_v63  ;;  %v414_v59 = vshll.u32 %v405_v50, %v412_v63 }
 0x23b   :  { %v527_v8 = vmul.f32 %v526_v57, %v524_v56  ;;  %v415_v9 = vshrl.u32 %v397_v2, %v413_v45  ;;  %v418_v60 = vadd.s32 127, %v417_v46  ;;  %v2293_v57 = vsub.s32 0, %v2209_v20 }
 0x23d   :  { %v528_v10 = vxor.u32 2147483648, %v527_v8  ;;  %v416_v14 = vor.u32 %v415_v9, %v414_v59  ;;  %v419_v15 = vshll.u32 %v418_v60, 23 }
 0x23f   :  { %v529_v12 = vsel %vm446_vm2, %v528_v10, %v527_v8  ;;  %v420_v17 = vor.u32 4788187, %v419_v15  ;;  %v423_v19 = vcvt.s32.f32 %v416_v14  ;;  %vm439_vm2 = vcmp.eq.s32.totalorder %v434_v43, 2 }
 0x240   :  { %v532_v13 = vsel %vm445_vm3, %v2227_v38, %v529_v12  ;;  %vm642_vm3 = vcmp.lt.s32.totalorder %v641_v51, 2  ;;  %v145_v8 = vrot.slane %v2217_v22, %v2293_v57  ;;  %v831_v51 = vld [vmem:[%s2664_s0 + $0x10] sm:$0xff] }
 0x241   :  { %1777 = vcosq.f32 %v532_v13  ;;  %v421_v18 = vand.u32 2147483647, %v420_v17 }
 0x242   :  { %1779 = vsinq.f32 %v532_v13  ;;  %v226_v63 = vadd.f32 %v2221_v24, %v145_v8 }
 0x243   :  { %v424_v25 = vmul.f32 %v423_v19, %v421_v18 }
 0x245   :  { %v425_v11 = vxor.u32 2147483648, %v424_v25 }
 0x247   :  { %v426_v42 = vsel %vm343_vm4, %v425_v11, %v424_v25  ;;  %vm433_vm4 = vweird.f32 %v2232_v41 }
 0x248   :  { %v429_v29 = vsel %vm342_vm5, %v2232_v41, %v426_v42  ;;  %vm435_vm5 = vcmp.lt.s32.totalorder %v434_v43, 2  ;;  %v232_v41 = vadd.f32 %v2223_v27, %v145_v8 }
 0x249   :  { %1781 = vcosq.f32 %v429_v29 }
 0x24a   :  { %1783 = vsinq.f32 %v429_v29 }
 0x24b   :  { %1785 = vtanh.f32 %v226_v63  ;;  %v933_v63 = vld [vmem:[%s2632_s6 + $0x48] sm:$0xff] }
 0x24c   :  { %1787 = vtanh.f32 %v232_v41 }
 0x24e   :  { %v1778_v32 = vpop.eup %1777 }
 0x24f   :  { %v1780_v33 = vpop.eup %1779  ;;  %v543_v34 = vxor.u32 2147483648, %v1778_v32 }
 0x250   :  { %v540_v35 = vxor.u32 2147483648, %v1780_v33 }
 0x251   :  { %v752_v37 = vsel %vm750_vm6, %v543_v34, %v1780_v33  ;;  %v544_v44 = vsel %vm542_vm9, %v543_v34, %v1780_v33  ;;  %v843_v33 = vld [vmem:[%s2664_s0 + $0x70] sm:$0xff]  ;;  %v842_v34 = vld [vmem:[%s2664_s0 + $0x68] sm:$0xff] }
 0x252   :  { %v749_v48 = vsel %vm747_vm7, %v1778_v32, %v540_v35  ;;  %v541_v39 = vsel %vm539_vm8, %v1778_v32, %v540_v35  ;;  %v844_v32 = vld [vmem:[%s2664_s0 + $0x78] sm:$0xff]  ;;  %v841_v35 = vld [vmem:[%s2664_s0 + $0x60] sm:$0xff] }
 0x253   :  { %v753_v47 = vsel %vm746_vm10, %v749_v48, %v752_v37  ;;  %v545_v50 = vsel %vm538_vm12, %v541_v39, %v544_v44  ;;  %1699 = vmatprep.subr.mxu0 %v844_v32  ;;  %v839_v37 = vld [vmem:[%s2664_s0 + $0x50] sm:$0xff]  ;;  %v838_v48 = vld [vmem:[%s2664_s0 + $0x48] sm:$0xff]  ;;  %v837_v39 = vld [vmem:[%s2664_s0 + $0x40] sm:$0xff] }
 0x254   :  { %v754_v49 = vsel %vm536_vm11, nan, %v753_v47  ;;  %v546_v52 = vsel %vm536_vm11, nan, %v545_v50  ;;  %1700 = vmatpush3.msra.mxu0 %v844_v32  ;;  %v836_v44 = vld [vmem:[%s2664_s0 + $0x38] sm:$0xff]  ;;  %v835_v47 = vld [vmem:[%s2664_s0 + $0x30] sm:$0xff]  ;;  %v924_v32 = vld [vmem:[%s2632_s6] sm:$0xff] }
 0x255   :  { %761 = vrot.lane.b32.xlu1 %v754_v49, %s2037_s24  ;;  %1701 = vmatprep.subr.mxu0 %v843_v33  ;;  %v832_v50 = vld [vmem:[%s2664_s0 + $0x18] sm:$0xff] }
 0x256   :  { %v1782_v53 = vpop.eup %1781  ;;  %1702 = vmatpush3.msra.mxu0 %v843_v33  ;;  %v1137_v33 = vld [vmem:[#allocation10 + $0x8] sm:$0xff] }
 0x257   :  { %v1784_v54 = vpop.eup %1783  ;;  %v440_v55 = vxor.u32 2147483648, %v1782_v53  ;;  %1703 = vmatprep.subr.mxu0 %v842_v34 }
 0x258   :  { %v437_v58 = vxor.u32 2147483648, %v1784_v54  ;;  %v1786_v2 = vpop.eup %1785  ;;  %1704 = vmatpush3.msra.mxu0 %v842_v34  ;;  %v1054_v34 = vld [vmem:[#allocation8 + $0x78] sm:$0xff] }
 0x259   :  { %783 = vrot.lane.b32.xlu1 %v546_v52, %s2037_s24  ;;  %v648_v38 = vsel %vm646_vm13, %v440_v55, %v1784_v54  ;;  %v441_v3 = vsel %vm439_vm2, %v440_v55, %v1784_v54  ;;  %v1788_v7 = vpop.eup %1787  ;;  %1705 = vmatprep.subr.mxu0 %v841_v35  ;;  %v830_v55 = vld [vmem:[%s2664_s0 + $0x8] sm:$0xff] }
 0x25a   :  { %v645_v62 = vsel %vm643_vm14, %v1782_v53, %v437_v58  ;;  %v438_v1 = vsel %vm436_vm15, %v1782_v53, %v437_v58  ;;  %v756_v17 = vmul.f32 %v1788_v7, %v546_v52  ;;  %v778_v18 = vmul.f32 %v1788_v7, %v754_v49  ;;  %1706 = vmatpush3.msra.mxu0 %v841_v35  ;;  %v833_v49 = vld [vmem:[%s2664_s0 + $0x20] sm:$0xff]  ;;  %v1136_v35 = vld [vmem:[#allocation10] sm:$0xff] }
 0x25b   :  { %v649_v4 = vsel %vm642_vm3, %v645_v62, %v648_v38  ;;  %v442_v6 = vsel %vm435_vm5, %v438_v1, %v441_v3  ;;  %1707 = vmatprep.subr.mxu0 %v840_v36  ;;  %v829_v58 = vld [vmem:[%s2664_s0] sm:$0xff]  ;;  %v939_v38 = vld [vmem:[%s2632_s6 + $0x78] sm:$0xff]  ;;  %v938_v62 = vld [vmem:[%s2632_s6 + $0x70] sm:$0xff] }
 0x25c   :  { %v650_v5 = vsel %vm433_vm4, nan, %v649_v4  ;;  %v443_v56 = vsel %vm433_vm4, nan, %v442_v6  ;;  %1708 = vmatpush3.msra.mxu0 %v840_v36  ;;  %v1151_v1 = vld [vmem:[#allocation10 + $0x78] sm:$0xff]  ;;  %974 = vmatprep.subr.mxu1 %v939_v38  ;;  %v936_v4 = vld [vmem:[%s2632_s6 + $0x60] sm:$0xff]  ;;  %v935_v6 = vld [vmem:[%s2632_s6 + $0x58] sm:$0xff] }
 0x25d   :  { %759 = vrot.lane.b32.xlu0 %v650_v5, %s2037_s24  ;;  %v755_v27 = vmul.f32 %v1786_v2, %v443_v56  ;;  %v777_v12 = vmul.f32 %v1786_v2, %v650_v5  ;;  %1709 = vmatprep.subr.mxu0 %v839_v37  ;;  %v937_v3 = vld [vmem:[%s2632_s6 + $0x68] sm:$0xff]  ;;  %v1039_v38 = vld [vmem:[#allocation8] sm:$0xff] }
 0x25e   :  { %1710 = vmatpush3.msra.mxu0 %v839_v37  ;;  %975 = vmatpush1.msra.mxu1 %v938_v62  ;;  %v1053_v37 = vld [vmem:[#allocation8 + $0x70] sm:$0xff]  ;;  %v940_v62 = vld [vmem:[%s2634_s8] sm:$0x3] }
 0x25f   :  { %1711 = vmatprep.subr.mxu0 %v838_v48  ;;  %976 = vmatprep.subr.mxu1 %v937_v3  ;;  %v945_v3 = vrot.slane %v940_v62, %v2293_v57 }
 0x260   :  { %1712 = vmatpush3.msra.mxu0 %v838_v48  ;;  %977 = vmatpush1.msra.mxu1 %v936_v4 }
 0x261   :  { %781 = vrot.lane.b32.xlu0 %v443_v56, %s2037_s24  ;;  %1713 = vmatprep.subr.mxu0 %v837_v39  ;;  %v934_v56 = vld [vmem:[%s2632_s6 + $0x50] sm:$0xff] }
 0x262   :  { %1714 = vmatpush3.msra.mxu0 %v837_v39  ;;  %978 = vmatprep.subr.mxu1 %v935_v6  ;;  %v1052_v39 = vld [vmem:[#allocation8 + $0x68] sm:$0xff] }
 0x263   :  { %1715 = vmatprep.subr.mxu0 %v836_v44  ;;  %979 = vmatpush1.msra.mxu1 %v934_v56 }
 0x264   :  { %1716 = vmatpush3.msra.mxu0 %v836_v44  ;;  %980 = vmatprep.subr.mxu1 %v933_v63  ;;  %v1051_v44 = vld [vmem:[#allocation8 + $0x60] sm:$0xff] }
 0x265   :  { %1717 = vmatprep.subr.mxu0 %v835_v47 }
 0x266   :  { %1718 = vmatpush3.msra.mxu0 %v835_v47  ;;  %v1050_v47 = vld [vmem:[#allocation8 + $0x58] sm:$0xff] }
 0x267   :  { %1719 = vmatprep.subr.mxu0 %v834_v40 }
 0x268   :  { %1720 = vmatpush3.msra.mxu0 %v834_v40  ;;  %v1049_v40 = vld [vmem:[#allocation8 + $0x50] sm:$0xff] }
 0x269   :  { %1721 = vmatprep.subr.mxu0 %v833_v49 }
 0x26a   :  { %1722 = vmatpush3.msra.mxu0 %v833_v49  ;;  %v1048_v49 = vld [vmem:[#allocation8 + $0x48] sm:$0xff] }
 0x26b   :  { %1723 = vmatprep.subr.mxu0 %v832_v50 }
 0x26c   :  { %1724 = vmatpush3.msra.mxu0 %v832_v50  ;;  %v1047_v50 = vld [vmem:[#allocation8 + $0x40] sm:$0xff] }
 0x26d   :  { %1725 = vmatprep.subr.mxu0 %v831_v51 }
 0x26e   :  { %1726 = vmatpush3.msra.mxu0 %v831_v51  ;;  %v1046_v51 = vld [vmem:[#allocation8 + $0x38] sm:$0xff] }
 0x26f   :  { %1727 = vmatprep.subr.mxu0 %v830_v55 }
 0x270   :  { %1728 = vmatpush3.msra.mxu0 %v830_v55  ;;  %v1041_v55 = vld [vmem:[#allocation8 + $0x10] sm:$0xff] }
 0x271   :  { %1729 = vmatprep.subr.mxu0 %v829_v58 }
 0x272   :  { %1730 = vmatpush3.msra.mxu0 %v829_v58  ;;  %v1040_v58 = vld [vmem:[#allocation8 + $0x8] sm:$0xff] }
 0x273   :  { %1180 = vmatprep.subr.mxu0 %v1151_v1  ;;  %v1152_v1 = vld [vmem:[%s2636_s10] sm:$0x3] }
 0x274   :  { %v1157_v4 = vrot.slane %v1152_v1, %v2293_v57  ;;  %v1161_v6 = vrot.slane %v1152_v1, %v2212_v21  ;;  %v1347_v1 = vld [vmem:[%s2639_s13 + $0x28] sm:$0xff] }
 0x2c7   :  { %v762_v45 = vpop.permute.xlu1 %761 }
 0x2c8   :  { %v766_v9 = vmul.f32 %v1788_v7, %v762_v45  ;;  %v932_v45 = vld [vmem:[%s2632_s6 + $0x40] sm:$0xff] }
 0x2c9   :  { %981 = vmatpush1.msra.mxu1 %v932_v45 }
 0x2cb   :  { %v784_v60 = vpop.permute.xlu1 %783 }
 0x2cc   :  { %v788_v22 = vmul.f32 %v1788_v7, %v784_v60  ;;  %v930_v7 = vld [vmem:[%s2632_s6 + $0x30] sm:$0xff] }
 0x2cd   :  { %v926_v60 = vld [vmem:[%s2632_s6 + $0x10] sm:$0xff] }
 0x2cf   :  { %v760_v46 = vpop.permute.xlu0 %759 }
 0x2d0   :  { %v765_v10 = vmul.f32 %v1786_v2, %v760_v46  ;;  %v931_v46 = vld [vmem:[%s2632_s6 + $0x38] sm:$0xff] }
 0x2d1   :  { %982 = vmatprep.subr.mxu1 %v931_v46 }
 0x2d2   :  { %769 = vrot.lane.b32.xlu0 %v765_v10, %s2037_s24  ;;  %983 = vmatpush1.msra.mxu1 %v930_v7 }
 0x2d3   :  { %v782_v59 = vpop.permute.xlu0 %781 }
 0x2d4   :  { %v787_v20 = vmul.f32 %v1786_v2, %v782_v59  ;;  %v929_v59 = vld [vmem:[%s2632_s6 + $0x28] sm:$0xff] }
 0x2d5   :  { %984 = vmatprep.subr.mxu1 %v929_v59 }
 0x2d6   :  { %791 = vrot.lane.b32.xlu1 %v787_v20, %s2037_s24  ;;  %771 = vrot.lane.b32.xlu0 %v766_v9, %s2037_s24  ;;  %v928_v9 = vld [vmem:[%s2632_s6 + $0x20] sm:$0xff]  ;;  %v927_v20 = vld [vmem:[%s2632_s6 + $0x18] sm:$0xff] }
 0x2d7   :  { %985 = vmatpush1.msra.mxu1 %v928_v9 }
 0x2d8   :  { %986 = vmatprep.subr.mxu1 %v927_v20 }
 0x2d9   :  { %987 = vmatpush1.msra.mxu1 %v926_v60 }
 0x2da   :  { %793 = vrot.lane.b32.xlu1 %v788_v22, %s2037_s24 }
 0x344   :  { %v770_v24 = vpop.permute.xlu0 %769 }
 0x345   :  { %v2303_v13 = vsub.f32 %v755_v27, %v770_v24 }
 0x347   :  { %v799_v19 = vmul.f32 %v2303_v13, %v2303_v13 }
 0x348   :  { %v792_v14 = vpop.permute.xlu1 %791  ;;  %v772_v15 = vpop.permute.xlu0 %771 }
 0x349   :  { %v2305_v16 = vadd.f32 %v792_v14, %v777_v12  ;;  %v2311_v25 = vsub.f32 %v756_v17, %v772_v15  ;;  %v1150_v17 = vld [vmem:[#allocation10 + $0x70] sm:$0xff] }
 0x34b   :  { %v801_v23 = vmul.f32 %v2305_v16, %v2305_v16  ;;  %v800_v42 = vmul.f32 %v2311_v25, %v2311_v25 }
 0x34c   :  { %v794_v61 = vpop.permute.xlu1 %793 }
 0x34d   :  { %v2313_v11 = vadd.f32 %v794_v61, %v778_v18  ;;  %v803_v28 = vadd.f32 %v801_v23, %v799_v19  ;;  %v1149_v18 = vld [vmem:[#allocation10 + $0x68] sm:$0xff]  ;;  %v1148_v19 = vld [vmem:[#allocation10 + $0x60] sm:$0xff]  ;;  %v1147_v23 = vld [vmem:[#allocation10 + $0x58] sm:$0xff] }
 0x34e   :  { %v1146_v61 = vld [vmem:[#allocation10 + $0x50] sm:$0xff] }
 0x34f   :  { %v802_v29 = vmul.f32 %v2313_v11, %v2313_v11  ;;  %v805_v30 = vsel %vm255_vm1, %v803_v28, 0.0  ;;  %v1142_v28 = vld [vmem:[#allocation10 + $0x30] sm:$0xff] }
 0x350   :  { %806 = vadd.xlane.f32.xlu0 %v805_v30  ;;  %v1139_v30 = vld [vmem:[#allocation10 + $0x18] sm:$0xff] }
 0x351   :  { %v804_v26 = vadd.f32 %v802_v29, %v800_v42  ;;  %v1141_v42 = vld [vmem:[#allocation10 + $0x28] sm:$0xff]  ;;  %v1140_v29 = vld [vmem:[#allocation10 + $0x20] sm:$0xff] }
 0x353   :  { %v808_v31 = vsel %vm255_vm1, %v804_v26, 0.0  ;;  %v925_v26 = vld [vmem:[%s2632_s6 + $0x8] sm:$0xff] }
 0x354   :  { %809 = vadd.xlane.f32.xlu1 %v808_v31  ;;  %v1138_v31 = vld [vmem:[#allocation10 + $0x10] sm:$0xff]  ;;  %988 = vmatprep.subr.mxu1 %v925_v26 }
 0x355   :  { %989 = vmatpush1.msra.mxu1 %v924_v32 }
 0x356   :  { %1071 = vmatprep.subr.mxu1 %v1054_v34  ;;  %v1357_v34 = vld [vmem:[%s2639_s13 + $0x78] sm:$0xff] }
 0x3d9   :  { %v807_v52 = vpop.xlane.xlu0 %806 }
 0x3da   :  { %v811_v43 = vadd.f32 1e-12, %v807_v52  ;;  %v1045_v52 = vld [vmem:[#allocation8 + $0x30] sm:$0xff] }
 0x3dc   :  { %1789 = vrsqrt.f32 %v811_v43  ;;  %v1044_v43 = vld [vmem:[#allocation8 + $0x28] sm:$0xff] }
 0x3dd   :  { %v810_v53 = vpop.xlane.xlu1 %809 }
 0x3de   :  { %v812_v54 = vadd.f32 1e-12, %v810_v53  ;;  %v1043_v53 = vld [vmem:[#allocation8 + $0x20] sm:$0xff] }
 0x3e0   :  { %1791 = vrsqrt.f32 %v812_v54  ;;  %v1042_v54 = vld [vmem:[#allocation8 + $0x18] sm:$0xff] }
 0x3e9   :  { %v1790_v5 = vpop.eup %1789 }
 0x3ea   :  { %v817_v41 = vmul.f32 %v1790_v5, %v2305_v16  ;;  %v815_v12 = vmul.f32 %v1790_v5, %v2303_v13  ;;  %v1144_v13 = vld [vmem:[#allocation10 + $0x40] sm:$0xff]  ;;  %v949_v5 = vrot.slane %v940_v62, %v2212_v21  ;;  %v1363_v62 = vld [vmem:[%s2639_s13 + $0xa8] sm:$0xff] }
 0x3ed   :  { %v1792_v8 = vpop.eup %1791 }
 0x3ee   :  { %v818_v2 = vmul.f32 %v1792_v8, %v2313_v11  ;;  %v816_v14 = vmul.f32 %v1792_v8, %v2311_v25  ;;  %v1145_v11 = vld [vmem:[#allocation10 + $0x48] sm:$0xff]  ;;  %v1143_v25 = vld [vmem:[#allocation10 + $0x38] sm:$0xff] }
 0x3f0   :  { %v1764_v10 = vpack.i.bf16 %v818_v2, %v817_v41 }
 0x3f2   :  { %1765 = vrot.lane.b32.xlu0 %v1764_v10, %s2037_s24 }
 0x464   :  { %v1766_v22 = vpop.permute.xlu0 %1765 }
 0x465   :  { %v1768_v24 = vunpack.i.h.bf16 %v1766_v22  ;;  %v1767_v27 = vunpack.i.l.bf16 %v1766_v22 }
 0x467   :  { %v827_v15 = vsel %vm255_vm1, %v815_v12, %v1767_v27  ;;  %v828_v16 = vsel %vm255_vm1, %v816_v14, %v1768_v24 }
 0x468   :  { %1731 = vmatprep.mubr.f32.mxu0 %v827_v15 }
 0x469   :  { %1732 = vmatmul.mubr.f32.vlgmr.msra.gmra.mxu0 %v828_v16 }
 0x46a   :  { %1181 = vmatpush1.msra.mxu0 %v1150_v17  ;;  %1228 = vmatprep.mubr.f32.mxu0 %v2030_v0 }
 0x46b   :  { %1182 = vmatprep.subr.mxu0 %v1149_v18 }
 0x46c   :  { %1183 = vmatpush1.msra.mxu0 %v1148_v19 }
 0x46d   :  { %1184 = vmatprep.subr.mxu0 %v1147_v23 }
 0x46e   :  { %1185 = vmatpush1.msra.mxu0 %v1146_v61 }
 0x46f   :  { %1186 = vmatprep.subr.mxu0 %v1145_v11 }
 0x470   :  { %1187 = vmatpush1.msra.mxu0 %v1144_v13 }
 0x471   :  { %1188 = vmatprep.subr.mxu0 %v1143_v25 }
 0x472   :  { %1189 = vmatpush1.msra.mxu0 %v1142_v28 }
 0x473   :  { %1190 = vmatprep.subr.mxu0 %v1141_v42 }
 0x474   :  { %1191 = vmatpush1.msra.mxu0 %v1140_v29 }
 0x475   :  { %1192 = vmatprep.subr.mxu0 %v1139_v30 }
 0x476   :  { %1193 = vmatpush1.msra.mxu0 %v1138_v31 }
 0x477   :  { %1194 = vmatprep.subr.mxu0 %v1137_v33  ;;  %v1373_v33 = vld [vmem:[%s2639_s13 + $0xf8] sm:$0xff] }
 0x478   :  { %1195 = vmatpush1.msra.mxu0 %v1136_v35  ;;  %v1372_v35 = vld [vmem:[%s2639_s13 + $0xf0] sm:$0xff] }
 0x529   :  { %v1733_v36 = vpop.f32.mrf.mxu0 }
 0x52a   :  { %921 = vst [vmem:[#allocation11 + $0x8] sm:$0xff] %v1733_v36 }
 0x52b   :  { %v911_v48 = vpop.f32.mrf.mxu0 }
 0x52c   :  { %920 = vst [vmem:[#allocation11] sm:$0xff] %v911_v48  ;;  %1605 = vmatmul.mubr.msk.f32.vlgmr.msra.gmra.mxu1 %vm255_vm1, %v911_v48  ;;  %1609 = vmatmul.mubr.msk.f32.vlgmr.msra.gmra.mxu0 %vm255_vm1, %v911_v48 }
 0x52d   :  { %1072 = vmatpush1.msra.mxu1 %v1053_v37  ;;  %1028 = vmatprep.mubr.f32.mxu1 %v2030_v0  ;;  %v1371_v37 = vld [vmem:[%s2639_s13 + $0xe8] sm:$0xff] }
 0x52e   :  { %1073 = vmatprep.subr.mxu1 %v1052_v39  ;;  %1234 = vmatprep.mubr.f32.mxu0 %v2030_v0  ;;  %v1370_v39 = vld [vmem:[%s2639_s13 + $0xe0] sm:$0xff] }
 0x52f   :  { %1074 = vmatpush1.msra.mxu1 %v1051_v44  ;;  %v1354_v44 = vld [vmem:[%s2639_s13 + $0x60] sm:$0xff] }
 0x530   :  { %1075 = vmatprep.subr.mxu1 %v1050_v47  ;;  %1606 = vmatmul.mubr.msk.f32.gmra.mxu1 %vm255_vm1, %v1733_v36  ;;  %v1369_v47 = vld [vmem:[%s2639_s13 + $0xd8] sm:$0xff] }
 0x531   :  { %1076 = vmatpush1.msra.mxu1 %v1049_v40  ;;  %1610 = vmatmul.mubr.msk.f32.gmra.mxu0 %vm255_vm1, %v1733_v36  ;;  %v1353_v40 = vld [vmem:[%s2639_s13 + $0x58] sm:$0xff] }
 0x532   :  { %1077 = vmatprep.subr.mxu1 %v1048_v49  ;;  %1119 = vmatprep.mubr.f32.mxu1 %v2030_v0  ;;  %v1368_v49 = vld [vmem:[%s2639_s13 + $0xd0] sm:$0xff] }
 0x533   :  { %1078 = vmatpush1.msra.mxu1 %v1047_v50  ;;  %v1352_v50 = vld [vmem:[%s2639_s13 + $0x50] sm:$0xff] }
 0x534   :  { %1079 = vmatprep.subr.mxu1 %v1046_v51  ;;  %v1367_v51 = vld [vmem:[%s2639_s13 + $0xc8] sm:$0xff] }
 0x535   :  { %1080 = vmatpush1.msra.mxu1 %v1045_v52  ;;  %v1351_v52 = vld [vmem:[%s2639_s13 + $0x48] sm:$0xff] }
 0x536   :  { %1081 = vmatprep.subr.mxu1 %v1044_v43  ;;  %v1366_v43 = vld [vmem:[%s2639_s13 + $0xc0] sm:$0xff] }
 0x537   :  { %1082 = vmatpush1.msra.mxu1 %v1043_v53  ;;  %v1350_v53 = vld [vmem:[%s2639_s13 + $0x40] sm:$0xff] }
 0x538   :  { %1083 = vmatprep.subr.mxu1 %v1042_v54  ;;  %v1365_v54 = vld [vmem:[%s2639_s13 + $0xb8] sm:$0xff] }
 0x539   :  { %1084 = vmatpush1.msra.mxu1 %v1041_v55  ;;  %v1349_v55 = vld [vmem:[%s2639_s13 + $0x38] sm:$0xff] }
 0x53a   :  { %1085 = vmatprep.subr.mxu1 %v1040_v58  ;;  %v1364_v58 = vld [vmem:[%s2639_s13 + $0xb0] sm:$0xff] }
 0x53b   :  { %1086 = vmatpush1.msra.mxu1 %v1039_v38  ;;  %v1348_v38 = vld [vmem:[%s2639_s13 + $0x30] sm:$0xff] }
 0x53c   :  { %1607 = vmatmul.mubr.msk.f32.vlgmr.msra.gmra.mxu1 %vm255_vm1, %v911_v48  ;;  %1642 = vmatprep.subr.mxu1 %v1373_v33  ;;  %v1355_v48 = vld [vmem:[%s2639_s13 + $0x68] sm:$0xff] }
 0x53d   :  { %1125 = vmatprep.mubr.f32.mxu1 %v2030_v0  ;;  %1643 = vmatpush3.msra.mxu1 %v1357_v34 }
 0x53e   :  { %1644 = vmatprep.subr.mxu1 %v1372_v35 }
 0x540   :  { %1608 = vmatmul.mubr.msk.f32.gmra.mxu1 %vm255_vm1, %v1733_v36  ;;  %v1356_v36 = vld [vmem:[%s2639_s13 + $0x70] sm:$0xff] }
 0x541   :  { %1645 = vmatpush3.msra.mxu1 %v1356_v36 }
 0x542   :  { %1646 = vmatprep.subr.mxu1 %v1371_v37 }
 0x543   :  { %1647 = vmatpush3.msra.mxu1 %v1355_v48 }
 0x544   :  { %1648 = vmatprep.subr.mxu1 %v1370_v39 }
 0x545   :  { %1649 = vmatpush3.msra.mxu1 %v1354_v44 }
 0x546   :  { %1650 = vmatprep.subr.mxu1 %v1369_v47 }
 0x547   :  { %1651 = vmatpush3.msra.mxu1 %v1353_v40 }
 0x548   :  { %1652 = vmatprep.subr.mxu1 %v1368_v49 }
 0x549   :  { %1653 = vmatpush3.msra.mxu1 %v1352_v50 }
 0x54a   :  { %1654 = vmatprep.subr.mxu1 %v1367_v51 }
 0x54b   :  { %1655 = vmatpush3.msra.mxu1 %v1351_v52 }
 0x54c   :  { %1656 = vmatprep.subr.mxu1 %v1366_v43 }
 0x54d   :  { %1657 = vmatpush3.msra.mxu1 %v1350_v53 }
 0x54e   :  { %1658 = vmatprep.subr.mxu1 %v1365_v54 }
 0x54f   :  { %1659 = vmatpush3.msra.mxu1 %v1349_v55 }
 0x550   :  { %1660 = vmatprep.subr.mxu1 %v1364_v58 }
 0x551   :  { %1661 = vmatpush3.msra.mxu1 %v1348_v38 }
 0x552   :  { %1662 = vmatprep.subr.mxu1 %v1363_v62 }
 0x553   :  { %1663 = vmatpush3.msra.mxu1 %v1347_v1 }
 0x5ec   :  { %v1024_v56 = vpop.f32.mrf.mxu1  ;;  %v1230_v0 = vpop.f32.mrf.mxu0 }
 0x5ed   :  { %v1025_v8 = vadd.f32 %v1024_v56, %v945_v3  ;;  %v1231_v2 = vadd.f32 %v1230_v0, %v1157_v4  ;;  %v1360_v56 = vld [vmem:[%s2639_s13 + $0x90] sm:$0xff] }
 0x5ee   :  { %v1026_v63 = vpop.f32.mrf.mxu1  ;;  %v1232_v41 = vpop.f32.mrf.mxu0  ;;  %v1344_v0 = vld [vmem:[%s2639_s13 + $0x10] sm:$0xff] }
 0x5ef   :  { %1035 = vst [vmem:[#allocation14] sm:$0xff] %v1025_v8  ;;  %v1027_v45 = vadd.f32 %v1026_v63, %v949_v5  ;;  %v1233_v46 = vadd.f32 %v1232_v41, %v1161_v6  ;;  %v1359_v8 = vld [vmem:[%s2639_s13 + $0x88] sm:$0xff]  ;;  %v1358_v41 = vld [vmem:[%s2639_s13 + $0x80] sm:$0xff] }
 0x5f0   :  { %v1030_v10 = vpop.f32.mrf.mxu1  ;;  %v1343_v63 = vld [vmem:[%s2639_s13 + $0x8] sm:$0xff] }
 0x5f1   :  { %1036 = vst [vmem:[#allocation14 + $0x8] sm:$0xff] %v1027_v45  ;;  %v1031_v7 = vadd.f32 %v1030_v10, %v945_v3  ;;  %v1236_v59 = vpop.f32.mrf.mxu0  ;;  %v1243_v9 = vadd.f32 %v1233_v46, %v1231_v2  ;;  %v1362_v3 = vld [vmem:[%s2639_s13 + $0xa0] sm:$0xff] }
 0x5f2   :  { %v1032_v20 = vpop.f32.mrf.mxu1  ;;  %v1237_v24 = vadd.f32 %v1236_v59, %v1157_v4  ;;  %v1346_v4 = vld [vmem:[%s2639_s13 + $0x20] sm:$0xff]  ;;  %1664 = vmatprep.subr.mxu1 %v1362_v3 }
 0x5f3   :  { %1037 = vst [vmem:[#allocation14 + $0x10] sm:$0xff] %v1031_v7  ;;  %v1033_v60 = vadd.f32 %v1032_v20, %v949_v5  ;;  %v1238_v22 = vpop.f32.mrf.mxu0  ;;  %1244 = vadd.xlane.f32.xlu1 %v1243_v9  ;;  %v1361_v5 = vld [vmem:[%s2639_s13 + $0x98] sm:$0xff]  ;;  %1665 = vmatpush3.msra.mxu1 %v1346_v4  ;;  %v1241_v20 = vld [vmem:[%s2637_s11] sm:$0x3] }
 0x5f4   :  { %v1239_v27 = vadd.f32 %v1238_v22, %v1161_v6  ;;  %v1345_v6 = vld [vmem:[%s2639_s13 + $0x18] sm:$0xff]  ;;  %1666 = vmatprep.subr.mxu1 %v1361_v5  ;;  %v1280_v22 = vrot.slane %v1241_v20, %v2293_v57 }
 0x5f5   :  { %1038 = vst [vmem:[#allocation14 + $0x18] sm:$0xff] %v1033_v60  ;;  %1667 = vmatpush3.msra.mxu1 %v1345_v6  ;;  %v1242_v60 = vld [vmem:[%s2638_s12] sm:$0x3] }
 0x5f6   :  { %v1246_v12 = vadd.f32 %v1239_v27, %v1237_v24  ;;  %1668 = vmatprep.subr.mxu1 %v1360_v56 }
 0x5f7   :  { %1669 = vmatpush3.msra.mxu1 %v1344_v0 }
 0x5f8   :  { %1247 = vadd.xlane.f32.xlu1 %v1246_v12  ;;  %1670 = vmatprep.subr.mxu1 %v1359_v8  ;;  %v1295_v12 = vrot.slane %v1242_v60, %v2293_v57 }
 0x5f9   :  { %1671 = vmatpush3.msra.mxu1 %v1343_v63 }
 0x5fa   :  { %1672 = vmatprep.subr.mxu1 %v1358_v41 }
 0x5fc   :  { %v1121_v14 = vpop.f32.mrf.mxu1 }
 0x5fd   :  { %1132 = vst [vmem:[#allocation15] sm:$0xff] %v1121_v14 }
 0x5fe   :  { %v1123_v15 = vpop.f32.mrf.mxu1 }
 0x5ff   :  { %1133 = vst [vmem:[#allocation15 + $0x8] sm:$0xff] %v1123_v15 }
 0x600   :  { %v1127_v16 = vpop.f32.mrf.mxu1 }
 0x601   :  { %1134 = vst [vmem:[#allocation15 + $0x10] sm:$0xff] %v1127_v16  ;;  %v1299_v16 = vrot.slane %v1242_v60, %v2212_v21 }
 0x602   :  { %v1129_v17 = vpop.f32.mrf.mxu1 }
 0x603   :  { %1135 = vst [vmem:[#allocation15 + $0x18] sm:$0xff] %v1129_v17 }
 0x67c   :  { %v1245_v18 = vpop.xlane.xlu1 %1244 }
 0x67d   :  { %v1250_v19 = vmul.f32 0.00390625, %v1245_v18 }
 0x67f   :  { %v2445_v23 = vsub.f32 %v1231_v2, %v1250_v19  ;;  %v2447_v61 = vsub.f32 %v1233_v46, %v1250_v19  ;;  %v1342_v2 = vld [vmem:[%s2639_s13] sm:$0xff]  ;;  %s2038_s13 = smov [#allocation12]  }
 0x680   :  { %1673 = vmatpush3.msra.mxu1 %v1342_v2 }
 0x681   :  { %v1248_v11 = vpop.xlane.xlu1 %1247  ;;  %v1256_v13 = vmul.f32 %v2445_v23, %v2445_v23  ;;  %v1257_v25 = vmul.f32 %v2447_v61, %v2447_v61 }
 0x682   :  { %v1251_v28 = vmul.f32 0.00390625, %v1248_v11 }
 0x683   :  { %v1260_v42 = vadd.f32 %v1257_v25, %v1256_v13 }
 0x684   :  { %v2453_v29 = vsub.f32 %v1237_v24, %v1251_v28  ;;  %v2455_v30 = vsub.f32 %v1239_v27, %v1251_v28  ;;  %v1284_v24 = vrot.slane %v1241_v20, %v2212_v21 }
 0x685   :  { %1261 = vadd.xlane.f32.xlu1 %v1260_v42 }
 0x686   :  { %v1258_v26 = vmul.f32 %v2453_v29, %v2453_v29  ;;  %v1259_v31 = vmul.f32 %v2455_v30, %v2455_v30 }
 0x688   :  { %v1263_v32 = vadd.f32 %v1259_v31, %v1258_v26 }
 0x68a   :  { %1264 = vadd.xlane.f32.xlu1 %v1263_v32 }
 0x70e   :  { %v1262_v45 = vpop.xlane.xlu1 %1261 }
 0x70f   :  { %v1266_v46 = vmul.f32 0.00390625, %v1262_v45  ;;  %v1611_v45 = vld [vmem:[%s2640_s14] ss:$0 sm:$0xff]  ;;  %s1520_s14 = sshll.u32 %s2038_s13, 4  ;;  %s1521_s14 = int_to_ptr.vmem [resolvable:$true] %s1520_s14 }
 0x710   :  { %s1909_s3 = scalar_lea.vmem %s1521_s14, 256  ;;  %p1914_p12 = scmp.lt.s32.totalorder %s1521_s14, %s1521_s14 }
 0x711   :  { %v1268_v10 = vadd.f32 1e-05, %v1266_v46  ;;  %p1910_p11 = scmp.ne.s32.totalorder %s1521_s14, %s1909_s3  ;;  %p1915_p13 = scmp.lt.s32.totalorder %s1909_s3, %s1909_s3 }
 0x713   :  { %1793 = vrsqrt.f32 %v1268_v10  ;;  %v1265_v7 = vpop.xlane.xlu1 %1264  ;;  %p1916_p0 = por %p1915_p13, %p1914_p12 }
 0x714   :  { %v1267_v59 = vmul.f32 0.00390625, %v1265_v7 }
 0x715   :  { %p1917_p1 = pnand %p1916_p0, %p1910_p11 }
 0x716   :  { %v1269_v9 = vadd.f32 1e-05, %v1267_v59 }
 0x718   :  { %1795 = vrsqrt.f32 %v1269_v9 }
 0x720   :  { %v1794_v27 = vpop.eup %1793 }
 0x721   :  { %v1272_v14 = vmul.f32 %v1794_v27, %v2445_v23  ;;  %v1273_v15 = vmul.f32 %v1794_v27, %v2447_v61 }
 0x723   :  { %v1287_v17 = vmul.f32 %v1280_v22, %v1272_v14  ;;  %v1288_v18 = vmul.f32 %v1284_v24, %v1273_v15 }
 0x725   :  { %v1796_v19 = vpop.eup %1795  ;;  %v1302_v11 = vadd.f32 %v1295_v12, %v1287_v17  ;;  %v1303_v13 = vadd.f32 %v1299_v16, %v1288_v18 }
 0x726   :  { %v1274_v25 = vmul.f32 %v1796_v19, %v2453_v29  ;;  %v1275_v28 = vmul.f32 %v1796_v19, %v2455_v30 }
 0x727   :  { %v1311_v42 = vmul.f32 0.044715, %v1303_v13  ;;  %v1310_v26 = vmul.f32 0.044715, %v1302_v11  ;;  %v1307_v54 = vmul.f32 0.5, %v1303_v13  ;;  %v1306_v58 = vmul.f32 0.5, %v1302_v11 }
 0x728   :  { %v1289_v31 = vmul.f32 %v1280_v22, %v1274_v25  ;;  %v1290_v32 = vmul.f32 %v1284_v24, %v1275_v28 }
 0x729   :  { %v1315_v57 = vmul.f32 %v1311_v42, %v1303_v13  ;;  %v1314_v33 = vmul.f32 %v1310_v26, %v1302_v11 }
 0x72a   :  { %v1305_v23 = vadd.f32 %v1299_v16, %v1290_v32  ;;  %v1304_v34 = vadd.f32 %v1295_v12, %v1289_v31 }
 0x72b   :  { %v1319_v61 = vmul.f32 %v1315_v57, %v1303_v13  ;;  %v1318_v35 = vmul.f32 %v1314_v33, %v1302_v11 }
 0x72c   :  { %v1313_v21 = vmul.f32 0.044715, %v1305_v23  ;;  %v1312_v36 = vmul.f32 0.044715, %v1304_v34  ;;  %v1309_v5 = vmul.f32 0.5, %v1305_v23  ;;  %v1308_v56 = vmul.f32 0.5, %v1304_v34 }
 0x72d   :  { %v1323_v37 = vadd.f32 %v1319_v61, %v1303_v13  ;;  %v1322_v48 = vadd.f32 %v1318_v35, %v1302_v11 }
 0x72e   :  { %v1317_v39 = vmul.f32 %v1313_v21, %v1305_v23  ;;  %v1316_v44 = vmul.f32 %v1312_v36, %v1304_v34 }
 0x72f   :  { %v1327_v47 = vmul.f32 0.7978846, %v1323_v37  ;;  %v1326_v29 = vmul.f32 0.7978846, %v1322_v48 }
 0x730   :  { %v1321_v40 = vmul.f32 %v1317_v39, %v1305_v23  ;;  %v1320_v30 = vmul.f32 %v1316_v44, %v1304_v34 }
 0x731   :  { %1797 = vtanh.f32 %v1327_v47 }
 0x732   :  { %1799 = vtanh.f32 %v1326_v29  ;;  %v1325_v49 = vadd.f32 %v1321_v40, %v1305_v23  ;;  %v1324_v50 = vadd.f32 %v1320_v30, %v1304_v34 }
 0x734   :  { %v1329_v51 = vmul.f32 0.7978846, %v1325_v49  ;;  %v1328_v52 = vmul.f32 0.7978846, %v1324_v50 }
 0x736   :  { %1801 = vtanh.f32 %v1329_v51 }
 0x737   :  { %1803 = vtanh.f32 %v1328_v52 }
 0x73e   :  { %v1798_v43 = vpop.eup %1797 }
 0x73f   :  { %v1800_v53 = vpop.eup %1799  ;;  %v1335_v55 = vadd.f32 1.0, %v1798_v43 }
 0x740   :  { %v1334_v38 = vadd.f32 1.0, %v1800_v53 }
 0x741   :  { %v1339_v62 = vmul.f32 %v1335_v55, %v1307_v54 }
 0x742   :  { %v1338_v1 = vmul.f32 %v1334_v38, %v1306_v58 }
 0x743   :  { %v1802_v3 = vpop.eup %1801  ;;  %1445 = vmatprep.mubr.f32.mxu1 %v1339_v62 }
 0x744   :  { %v1804_v4 = vpop.eup %1803  ;;  %1446 = vmatmul.mubr.f32.vlgmr.msra.gmra.mxu1 %v1338_v1  ;;  %v1337_v6 = vadd.f32 1.0, %v1802_v3 }
 0x745   :  { %v1336_v0 = vadd.f32 1.0, %v1804_v4 }
 0x746   :  { %v1341_v8 = vmul.f32 %v1337_v6, %v1309_v5 }
 0x747   :  { %v1340_v63 = vmul.f32 %v1336_v0, %v1308_v56 }
 0x748   :  { %1450 = vmatprep.mubr.f32.mxu1 %v1341_v8 }
 0x749   :  { %1451 = vmatmul.mubr.f32.gmra.mxu1 %v1340_v63 }
 0x804   :  { %v1674_v41 = vpop.f32.mrf.mxu1 }
 0x806   :  { %v1675_v2 = vpop.f32.mrf.mxu1 }
 0x807   :  { %v1676_v46 = vadd.f32 %v1675_v2, %v1674_v41 }
 0x809   :  { %v1677_v10 = vpop.f32.mrf.mxu1  ;;  %v1448_v7 = vadd.f32 %v1676_v46, %v1611_v45 }
 0x80b   :  { %v1678_v59 = vpop.f32.mrf.mxu1  ;;  %v1458_v9 = vsel %vm152_vm0, %v1448_v7, 0.0 }
 0x80c   :  { %v1679_v20 = vadd.f32 %v1678_v59, %v1677_v10  ;;  %1459 = vadd.xlane.f32.xlu1 %v1458_v9 }
 0x80e   :  { %v1453_v60 = vadd.f32 %v1679_v20, %v1611_v45 }
 0x810   :  { %v1461_v22 = vsel %vm152_vm0, %v1453_v60, 0.0 }
 0x811   :  { %1462 = vadd.xlane.f32.xlu0 %v1461_v22 }
 0x895   :  { %v1460_v24 = vpop.xlane.xlu1 %1459 }
 0x896   :  { %v1465_v27 = vmul.f32 0.03125, %v1460_v24 }
 0x898   :  { %v2576_v12 = vsub.f32 %v1448_v7, %v1465_v27 }
 0x89a   :  { %v1463_v14 = vpop.xlane.xlu0 %1462  ;;  %v1469_v15 = vmul.f32 %v2576_v12, %v2576_v12 }
 0x89b   :  { %v1466_v16 = vmul.f32 0.03125, %v1463_v14 }
 0x89c   :  { %v1471_v17 = vsel %vm152_vm0, %v1469_v15, 0.0 }
 0x89d   :  { %v2581_v18 = vsub.f32 %v1453_v60, %v1466_v16  ;;  %1472 = vadd.xlane.f32.xlu1 %v1471_v17 }
 0x89f   :  { %v1470_v19 = vmul.f32 %v2581_v18, %v2581_v18 }
 0x8a1   :  { %v1474_v11 = vsel %vm152_vm0, %v1470_v19, 0.0 }
 0x8a2   :  { %1475 = vadd.xlane.f32.xlu1 %v1474_v11 }
 0x8a3   :  { %1920 = shalt.err (!%p1917_p1)
}
 0x8a4   :  { %1526 = dma.vmem_to_hbm [thread:$0]  %s1521_s14, 256, %s2644_s18, [#allocation13], %s2023_s28, %s2023_s28, %s2024_s29  }
 0x8a5   :  { %s1929_s30 = scalar_lea.vmem %s1545_s2, 512  ;;  %p1934_p3 = scmp.lt.s32.totalorder %s1545_s2, %s1545_s2 }
 0x8a6   :  { %p1930_p2 = scmp.ne.s32.totalorder %s1545_s2, %s1929_s30  ;;  %p1935_p4 = scmp.lt.s32.totalorder %s1929_s30, %s1929_s30 }
 0x8a8   :  { %p1936_p5 = por %p1935_p4, %p1934_p3 }
 0x8aa   :  { %p1937_p6 = pnand %p1936_p5, %p1930_p2 }
 0x8ac   :  { %1940 = shalt.err (!%p1937_p6)
}
 0x8ad   :  { %1550 = dma.vmem_to_hbm [thread:$0]  %s1545_s2, 512, %s2646_s20, [#allocation16], %s2661_s26, %s2661_s26, %s2026_s23  }
 0x8ae   :  { %s2040_s6 = smov [#allocation11]   ;;  %s2041_s7 = smov [#allocation14]  }
 0x8af   :  { %s1508_s25 = sshll.u32 %s2040_s6, 4  ;;  %s1532_s27 = sshll.u32 %s2041_s7, 4  ;;  %s1509_s25 = int_to_ptr.vmem [resolvable:$true] %s1508_s25  ;;  %s1533_s27 = int_to_ptr.vmem [resolvable:$true] %s1532_s27 }
 0x8b0   :  { %s1949_s18 = scalar_lea.vmem %s1509_s25, 256  ;;  %p1954_p8 = scmp.lt.s32.totalorder %s1509_s25, %s1509_s25 }
 0x8b1   :  { %p1950_p7 = scmp.ne.s32.totalorder %s1509_s25, %s1949_s18  ;;  %p1955_p9 = scmp.lt.s32.totalorder %s1949_s18, %s1949_s18 }
 0x8b3   :  { %p1956_p10 = por %p1955_p9, %p1954_p8 }
 0x8b5   :  { %p1957_p11 = pnand %p1956_p10, %p1950_p7 }
 0x8b7   :  { %1960 = shalt.err (!%p1957_p11)
}
 0x8b8   :  { %1514 = dma.vmem_to_hbm [thread:$0]  %s1509_s25, 256, %s2643_s17, [#allocation4], %s2023_s28, %s2023_s28, %s2024_s29  }
 0x8b9   :  { %s1969_s20 = scalar_lea.vmem %s1533_s27, 512  ;;  %p1974_p13 = scmp.lt.s32.totalorder %s1533_s27, %s1533_s27 }
 0x8ba   :  { %p1970_p12 = scmp.ne.s32.totalorder %s1533_s27, %s1969_s20  ;;  %p1975_p0 = scmp.lt.s32.totalorder %s1969_s20, %s1969_s20 }
 0x8bc   :  { %p1976_p1 = por %p1975_p0, %p1974_p13 }
 0x8be   :  { %p1977_p2 = pnand %p1976_p1, %p1970_p12 }
 0x8c0   :  { %1980 = shalt.err (!%p1977_p2)
}
 0x8c1   :  { %1538 = dma.vmem_to_hbm [thread:$0]  %s1533_s27, 512, %s2645_s19, [#allocation13], %s2661_s26, %s2661_s26, %s2026_s23  }
 0x8c2   :  { %v1612_v57 = vld [vmem:[%s2641_s15] ss:$0 sm:$0xff]  ;;  %s2042_s19 = smov [#allocation17]  }
 0x8c3   :  { %v1613_v23 = vld [vmem:[%s2642_s16] ss:$0 sm:$0xff]  ;;  %s1556_s23 = sshll.u32 %s2042_s19, 4  ;;  %s1557_s23 = int_to_ptr.vmem [resolvable:$true] %s1556_s23 }
 0x8c4   :  { %s1989_s15 = scalar_lea.vmem %s1557_s23, 256  ;;  %p1994_p4 = scmp.lt.s32.totalorder %s1557_s23, %s1557_s23 }
 0x8c5   :  { %p1990_p3 = scmp.ne.s32.totalorder %s1557_s23, %s1989_s15  ;;  %p1995_p5 = scmp.lt.s32.totalorder %s1989_s15, %s1989_s15 }
 0x8c7   :  { %p1996_p6 = por %p1995_p5, %p1994_p4 }
 0x8c9   :  { %p1997_p7 = pnand %p1996_p6, %p1990_p3 }
 0x926   :  { %v1473_v13 = vpop.xlane.xlu1 %1472 }
 0x927   :  { %v1477_v25 = vmul.f32 0.03125, %v1473_v13 }
 0x929   :  { %v1479_v28 = vadd.f32 1e-05, %v1477_v25 }
 0x92b   :  { %1805 = vrsqrt.f32 %v1479_v28  ;;  %v1476_v42 = vpop.xlane.xlu1 %1475 }
 0x92c   :  { %v1478_v26 = vmul.f32 0.03125, %v1476_v42 }
 0x92e   :  { %v1480_v31 = vadd.f32 1e-05, %v1478_v26 }
 0x930   :  { %1807 = vrsqrt.f32 %v1480_v31 }
 0x938   :  { %v1806_v32 = vpop.eup %1805 }
 0x939   :  { %v1483_v33 = vmul.f32 %v1806_v32, %v2576_v12 }
 0x93b   :  { %v1491_v34 = vmul.f32 %v1612_v57, %v1483_v33 }
 0x93d   :  { %v1808_v61 = vpop.eup %1807  ;;  %v1499_v35 = vadd.f32 %v1613_v23, %v1491_v34 }
 0x93e   :  { %v1484_v21 = vmul.f32 %v1808_v61, %v2581_v18 }
 0x93f   :  { %1501 = vst.msk [vmem:[#allocation17] sm:$0xff] %vm152_vm0, %v1499_v35 }
 0x940   :  { %v1492_v36 = vmul.f32 %v1612_v57, %v1484_v21 }
 0x942   :  { %v1500_v37 = vadd.f32 %v1613_v23, %v1492_v36 }
 0x944   :  { %1502 = vst.msk [vmem:[#allocation17 + $0x8] sm:$0xff] %vm152_vm0, %v1500_v37 }
 0x945   :  { %2000 = shalt.err (!%p1997_p7)
}
 0x946   :  { %1562 = dma.vmem_to_hbm [thread:$0]  %s1557_s23, 256, %s2647_s21, [#allocation16], %s2023_s28, %s2023_s28, %s2024_s29  }
 0x947   :  { %2015 = dma.done.wait [#allocation4], 256  }
 0x948   :  { %2016 = vsyncadd [#allocation4], 4294967040 }
 0x949   :  { %2017 = dma.done.wait [#allocation13], 768  }
 0x94a   :  { %2018 = vsyncadd [#allocation13], 4294966528 }
 0x94b   :  { %2019 = dma.done.wait [#allocation16], 768  }
 0x94c   :  { %2020 = vsyncadd [#allocation16], 4294966528 }
 0x94d   :  { %1578 = vsyncpa [#allocation3], 1 }
 0x94e   :  { %1579 = vsyncpa [#allocation6], 1 }
 0x94f   :  { %1580 = vsyncpa [#allocation9], 1 }
 0x950   :  { %1581 = vsyncpa [#allocation4], 1 }
 0x951   :  { %1582 = vsyncpa [#allocation13], 1 }
 0x952   :  { %1583 = vsyncpa [#allocation16], 1 }

</bundles_post_ra>
